<compile_context>
chip_gen: v7x
topology: tpu7x:2x2x1
jax: 0.10.0
libtpu: 0.0.40
codegen_flags: <defaults>
</compile_context>

<pallas_src>
import math
from functools import partial

import jax
import jax.numpy as jnp
from jax import lax
from jax.experimental import pallas as pl
from jax.experimental.pallas import tpu as pltpu


# ----------------------------- small helpers -----------------------------

def _pick_tile(dim, pref, align=128):
    """Largest multiple of `align` that divides `dim` and is <= pref; else full dim.

    Guarantees every block is either a (8,128)-friendly multiple or the full extent
    (always a legal block shape), and that tiles divide the array exactly.
    """
    if dim % pref == 0:
        return pref
    best = None
    t = align
    limit = min(pref, dim)
    while t <= limit:
        if dim % t == 0:
            best = t
        t += align
    # TODO(synk): for dims that are not multiples of 128, pad to a tile multiple
    # instead of falling back to the full extent (only matters for very long T).
    return best if best is not None else dim


def _vmem_limit_bytes(nbytes):
    """Generation-aware scoped-VMEM limit: 2x estimated working set, capped near
    physical VMEM (≈56 MiB on v7x, ≈120 MiB on 128-MiB parts)."""
    try:
        phys = pltpu.get_tpu_info().vmem_capacity_bytes
    except Exception:
        phys = 64 * 2**20          # conservative (v7x per-core VMEM)
    cap = max(phys - 8 * 2**20, 16 * 2**20)
    return int(min(max(2 * nbytes, 32 * 2**20), cap))


def _resident_spec(shape, index_map):
    """BlockSpec for constant-index-map operands (revisited every grid step):
    single-buffer them so they don't pay 2x resident VMEM."""
    try:
        return pl.BlockSpec(shape, index_map, pipeline_mode=pl.Buffered(1))
    except Exception:                       # pragma: no cover - older Pallas
        return pl.BlockSpec(shape, index_map)


# --------------------------- fused QKV projection ---------------------------

def _qkv_kernel(x_ref, w_ref, b_ref, o_ref, acc_ref):
    @pl.when(pl.program_id(3) == 0)
    def _init():
        acc_ref[...] = jnp.zeros_like(acc_ref)

    acc_ref[...] += jnp.dot(x_ref[...], w_ref[0],
                            preferred_element_type=jnp.float32)

    @pl.when(pl.program_id(3) == pl.num_programs(3) - 1)
    def _finalize():
        o_ref[0] = (acc_ref[...] + b_ref[0]).astype(o_ref.dtype)


def qkv_projection(x, w, b, *, out_dtype=jnp.bfloat16, tm=512, tn=512, tk=512):
    """x: (M, K) bf16, w: (3, K, N) bf16, b: (3, 1, N) f32 -> (3, M, N) out_dtype.

    The leading grid axis selects the q/k/v third of the projection, so the output
    lands directly in the role-split (3, M, N) layout the attention kernel consumes
    (no extra HBM slicing pass).
    """
    M, K = x.shape
    _, _, N = w.shape
    tm, tn, tk = _pick_tile(M, tm), _pick_tile(N, tn), _pick_tile(K, tk)
    grid = (3, M // tm, N // tn, K // tk)

    work = (2 * (tm * tk + tk * tn) * 2                      # double-buffered bf16 input tiles
            + 2 * tn * 4                                     # bias tile
            + 2 * tm * tn * jnp.dtype(out_dtype).itemsize    # double-buffered output tile
            + tm * tn * 4)                                   # f32 accumulator
    return pl.pallas_call(
        _qkv_kernel,
        out_shape=jax.ShapeDtypeStruct((3, M, N), out_dtype),
        grid_spec=pltpu.PrefetchScalarGridSpec(
            num_scalar_prefetch=0,
            grid=grid,
            in_specs=[
                pl.BlockSpec((tm, tk), lambda r, i, j, k: (i, k)),
                pl.BlockSpec((1, tk, tn), lambda r, i, j, k: (r, k, j)),
                pl.BlockSpec((1, 1, tn), lambda r, i, j, k: (r, 0, j)),
            ],
            out_specs=pl.BlockSpec((1, tm, tn), lambda r, i, j, k: (r, i, j)),
            scratch_shapes=[pltpu.VMEM((tm, tn), jnp.float32)],
        ),
        compiler_params=pltpu.CompilerParams(
            dimension_semantics=("parallel", "parallel", "parallel", "arbitrary"),
            vmem_limit_bytes=_vmem_limit_bytes(work),
        ),
    )(x, w, b)


# ------------- fused RoPE + flash attention + output projection -------------

def _rope_half_packed(x, cos, sin, n_heads, head_dim):
    """Rotate-half RoPE on a head-packed (rows, H*hd) f32 tile (one pass per tile)."""
    hd2 = head_dim // 2
    parts = []
    for h in range(n_heads):
        lo = x[:, h * head_dim: h * head_dim + hd2]
        hi = x[:, h * head_dim + hd2: (h + 1) * head_dim]
        parts.append(-hi)
        parts.append(lo)
    x_rot = jnp.concatenate(parts, axis=-1)
    return x * cos + x_rot * sin


def _flash_rope_attn_kernel(q_ref, k_ref, v_ref, cos_q_ref, sin_q_ref,
                            cos_k_ref, sin_k_ref, wo_ref, bo_ref, o_ref,
                            qrot_sc, m_sc, l_sc, acc_sc,
                            *, n_heads, head_dim, scale):
    ki = pl.program_id(2)

    @pl.when(ki == 0)
    def _init():
        # RoPE + 1/sqrt(hd) scale on the query tile, once per (batch, q-tile);
        # cached in VMEM scratch (bf16) and reused across all kv steps.
        qf = q_ref[0, 0].astype(jnp.float32)
        qr = _rope_half_packed(qf,
                               cos_q_ref[...].astype(jnp.float32),
                               sin_q_ref[...].astype(jnp.float32),
                               n_heads, head_dim)
        qrot_sc[...] = (qr * scale).astype(jnp.bfloat16)
        m_sc[...] = jnp.full_like(m_sc, -jnp.inf)
        l_sc[...] = jnp.zeros_like(l_sc)
        acc_sc[...] = jnp.zeros_like(acc_sc)

    # RoPE on the key tile (all heads at once, f32 math on a (tk, d) slab, bf16 MXU feed).
    kf = k_ref[0, 0].astype(jnp.float32)
    k_rot = _rope_half_packed(kf,
                              cos_k_ref[...].astype(jnp.float32),
                              sin_k_ref[...].astype(jnp.float32),
                              n_heads, head_dim).astype(jnp.bfloat16)
    v = v_ref[0, 0]                                               # (tk, d) bf16

    # Online softmax, one head at a time.  Per-head state (m, l, context) lives in
    # VMEM scratch so every head's temporaries die at its scratch store (no cross-head
    # concatenate, bounded live ranges even though the loop is statically unrolled).
    # TODO(synk): when head_dim < 128, process pairs of heads per MXU call to keep
    # the lane dimension full.
    for h in range(n_heads):
        sl = slice(h * head_dim, (h + 1) * head_dim)
        s = lax.dot_general(qrot_sc[:, sl], k_rot[:, sl],
                            (((1,), (1,)), ((), ())),
                            preferred_element_type=jnp.float32)   # (tq, tk) f32
        m_prev = m_sc[:, h:h + 1]                                 # (tq, 1)
        m_new = jnp.maximum(m_prev, jnp.max(s, axis=-1, keepdims=True))
        alpha = jnp.exp(m_prev - m_new)
        p = jnp.exp(s - m_new)                                    # (tq, tk) f32
        l_sc[:, h:h + 1] = alpha * l_sc[:, h:h + 1] + jnp.sum(p, axis=-1, keepdims=True)
        m_sc[:, h:h + 1] = m_new
        acc_sc[:, sl] = alpha * acc_sc[:, sl] + jnp.dot(
            p.astype(jnp.bfloat16), v[:, sl], preferred_element_type=jnp.float32)

    @pl.when(ki == pl.num_programs(2) - 1)
    def _finalize():
        # Post-PV normalization on (tq, hd) context slices (NOT the (tq, tk) probs).
        for h in range(n_heads):
            sl = slice(h * head_dim, (h + 1) * head_dim)
            acc_sc[:, sl] = acc_sc[:, sl] * pl.reciprocal(l_sc[:, h:h + 1], approx=True)
        ctx = acc_sc[...].astype(jnp.bfloat16)                    # (tq, d) lane-packed
        out = jnp.dot(ctx, wo_ref[...], preferred_element_type=jnp.float32) + bo_ref[...]
        o_ref[0] = out.astype(o_ref.dtype)


def rope_attention(qkv3, cos, sin, wo, bo, n_heads, *, tq=256, tk=256):
    """qkv3: (3, B, T, d) bf16, cos/sin: (T, d) bf16, wo: (d, d) bf16, bo: (1, d) f32
    -> (B, T, d) f32."""
    _, B, T, d = qkv3.shape
    head_dim = d // n_heads
    tq = _pick_tile(T, tq)
    tk = _pick_tile(T, tk)
    grid = (B, T // tq, T // tk)

    work = (2 * tq * d * 2                 # q blocks (double-buffered bf16)
            + 2 * 2 * tk * d * 2           # k, v blocks
            + 2 * 2 * tq * d * 2           # cos/sin (q rows)
            + 2 * 2 * tk * d * 2           # cos/sin (kv rows)
            + d * d * 2 + d * 4            # Wo / bo (single-buffered)
            + 2 * tq * d * 4               # output block (f32)
            + tq * d * 2 + tq * d * 4      # scratch: rotated q (bf16) + acc (f32)
            + 2 * tq * 128 * 4             # scratch: m / l (lane-padded)
            + 6 * tq * tk * 4              # per-head score/prob temporaries (rough)
            + 4 * (tq + tk) * d * 4)       # RoPE temporaries (rough)

    kernel = partial(_flash_rope_attn_kernel, n_heads=n_heads, head_dim=head_dim,
                     scale=1.0 / math.sqrt(head_dim))
    return pl.pallas_call(
        kernel,
        out_shape=jax.ShapeDtypeStruct((B, T, d), jnp.float32),
        grid_spec=pltpu.PrefetchScalarGridSpec(
            num_scalar_prefetch=0,
            grid=grid,
            in_specs=[
                # q / k / v: three views of the same (3, B, T, d) tensor, each with its
                # own BlockSpec (q tiled by the query axis, k/v by the kv axis).
                pl.BlockSpec((1, 1, tq, d), lambda b, qi, ki: (0, b, qi, 0)),
                pl.BlockSpec((1, 1, tk, d), lambda b, qi, ki: (1, b, ki, 0)),
                pl.BlockSpec((1, 1, tk, d), lambda b, qi, ki: (2, b, ki, 0)),
                # cos/sin tiled along the query axis (q RoPE) and kv axis (k RoPE).
                pl.BlockSpec((tq, d), lambda b, qi, ki: (qi, 0)),
                pl.BlockSpec((tq, d), lambda b, qi, ki: (qi, 0)),
                pl.BlockSpec((tk, d), lambda b, qi, ki: (ki, 0)),
                pl.BlockSpec((tk, d), lambda b, qi, ki: (ki, 0)),
                # Out-projection weight/bias: constant index map, single-buffered.
                _resident_spec((d, d), lambda b, qi, ki: (0, 0)),
                _resident_spec((1, d), lambda b, qi, ki: (0, 0)),
            ],
            out_specs=pl.BlockSpec((1, tq, d), lambda b, qi, ki: (b, qi, 0)),
            scratch_shapes=[
                pltpu.VMEM((tq, d), jnp.bfloat16),           # RoPE'd + scaled q tile
                pltpu.VMEM((tq, n_heads), jnp.float32),      # running max per head
                pltpu.VMEM((tq, n_heads), jnp.float32),      # running sum per head
                pltpu.VMEM((tq, d), jnp.float32),            # context accumulator
            ],
        ),
        compiler_params=pltpu.CompilerParams(
            dimension_semantics=("parallel", "parallel", "arbitrary"),
            vmem_limit_bytes=_vmem_limit_bytes(work),
        ),
    )(qkv3, qkv3, qkv3, cos, sin, cos, sin, wo, bo)


# ----------------------------- model wiring -----------------------------

def rope_tables(T, n_heads, head_dim, base=10000.0, dtype=jnp.bfloat16):
    # TODO(synk): RotaryEmbedding source was not provided; standard rotate-half
    # (GPT-NeoX) RoPE with base 10000 is assumed.
    # The reference rotates q/k AFTER permute(0,2,1,3).reshape(B*H, T, hd), which mixes
    # head and time axes: element (b, t, h) gets rotary position (t*H + h) % T.  Bake
    # that in here, lane-packed to (T, H*hd) to match the packed q/k layout.
    inv_freq = 1.0 / (base ** (jnp.arange(0, head_dim, 2, dtype=jnp.float32) / head_dim))
    t = jnp.arange(T, dtype=jnp.int32)
    h = jnp.arange(n_heads, dtype=jnp.int32)
    pos = ((t[:, None] * n_heads + h[None, :]) % T).astype(jnp.float32)     # (T, H)
    freqs = pos[..., None] * inv_freq[None, None, :]                        # (T, H, hd/2)
    emb = jnp.concatenate([freqs, freqs], axis=-1)                          # (T, H, hd)
    d = n_heads * head_dim
    return (jnp.cos(emb).reshape(T, d).astype(dtype),
            jnp.sin(emb).reshape(T, d).astype(dtype))


def rotary_self_attention(params, x, n_heads):
    """x: (B, T, d_model) f32 -> (B, T, d_model) f32."""
    B, T, d = x.shape
    head_dim = d // n_heads
    qkv3 = qkv_projection(x.reshape(B * T, d).astype(jnp.bfloat16),
                          params["wqkv"], params["bqkv"])        # (3, B*T, d) bf16
    cos, sin = rope_tables(T, n_heads, head_dim)                 # bf16, shape-static
    return rope_attention(qkv3.reshape(3, B, T, d), cos, sin,
                          params["wo"], params["bo"], n_heads)


def init_params(key, d_model):
    lim = 1.0 / math.sqrt(d_model)
    k1, k2, k3, k4 = jax.random.split(key, 4)
    wqkv = jax.random.uniform(k1, (3, d_model, d_model), jnp.float32, -lim, lim)
    bqkv = jax.random.uniform(k2, (3, 1, d_model), jnp.float32, -lim, lim)
    wo = jax.random.uniform(k3, (d_model, d_model), jnp.float32, -lim, lim)
    bo = jax.random.uniform(k4, (1, d_model), jnp.float32, -lim, lim)
    return dict(wqkv=wqkv.astype(jnp.bfloat16), bqkv=bqkv,       # bf16 weights, f32 bias
                wo=wo.astype(jnp.bfloat16), bo=bo)


# ----------------------------- demo -----------------------------

if __name__ == "__main__":
    B, T, d_model, n_heads = 2, 8, 32, 4

    key = jax.random.PRNGKey(0)
    kp, kx = jax.random.split(key)
    params = init_params(kp, d_model)
    x = jax.random.normal(kx, (B, T, d_model), jnp.float32)

    fwd = jax.jit(rotary_self_attention, static_argnums=(2,))
    out = jax.block_until_ready(fwd(params, x, n_heads))

    assert out.shape == (B, T, d_model) and out.dtype == jnp.float32
    assert bool(jnp.all(jnp.isfinite(out)))
    print("KERNEL_OK")
</pallas_src>

<mosaic_0001>
module attributes {stable_mosaic.version = 11 : i64} {
  func.func @_qkv_kernel(%arg0: i32, %arg1: i32, %arg2: i32, %arg3: i32, %arg4: memref<16x32xbf16, #tpu.memory_space<vmem>>, %arg5: memref<1x32x32xbf16, #tpu.memory_space<vmem>>, %arg6: memref<1x1x32xf32, #tpu.memory_space<vmem>>, %arg7: memref<1x16x32xbf16, #tpu.memory_space<vmem>>, %arg8: memref<16x32xf32, #tpu.memory_space<vmem>>) attributes {dimension_semantics = [#tpu.dimension_semantics<parallel>, #tpu.dimension_semantics<parallel>, #tpu.dimension_semantics<parallel>, #tpu.dimension_semantics<arbitrary>], iteration_bounds = array<i64: 3, 1, 1, 1>, scalar_prefetch = 0 : i64, scratch_operands = 1 : i64, tpu.core_type = #tpu.core_type<tc>, window_params = [{transform_indices = @transform_0, window_bounds = array<i64: 16, 32>}, {transform_indices = @transform_1, window_bounds = array<i64: 1, 32, 32>}, {transform_indices = @transform_2, window_bounds = array<i64: 1, 1, 32>}, {transform_indices = @transform_3, window_bounds = array<i64: 1, 16, 32>}]} {
    %c0_i32 = arith.constant 0 : i32
    %0 = arith.cmpi eq, %arg3, %c0_i32 : i32
    %1 = arith.extui %0 : i1 to i32
    %c0_i32_0 = arith.constant 0 : i32
    %2 = arith.cmpi ne, %1, %c0_i32_0 : i32
    scf.if %2 {
      %cst_11 = arith.constant 0.000000e+00 : f32
      %13 = vector.broadcast %cst_11 : f32 to vector<16x32xf32>
      %c0_12 = arith.constant 0 : index
      %c0_13 = arith.constant 0 : index
      %14 = vector.load %arg8[%c0_12, %c0_13] : memref<16x32xf32, #tpu.memory_space<vmem>>, vector<16x32xf32>
      tpu.vector_store %arg8[%c0_12, %c0_13], %13 {strides = array<i32>} : memref<16x32xf32, #tpu.memory_space<vmem>>, vector<16x32xf32>,
    } else {
    }
    %c0 = arith.constant 0 : index
    %c0_1 = arith.constant 0 : index
    %3 = vector.load %arg8[%c0, %c0_1] : memref<16x32xf32, #tpu.memory_space<vmem>>, vector<16x32xf32>
    %c0_2 = arith.constant 0 : index
    %c0_3 = arith.constant 0 : index
    %4 = vector.load %arg4[%c0_2, %c0_3] : memref<16x32xbf16, #tpu.memory_space<vmem>>, vector<16x32xbf16>
    %c0_4 = arith.constant 0 : index
    %c0_5 = arith.constant 0 : index
    %c0_6 = arith.constant 0 : index
    %5 = vector.load %arg5[%c0_4, %c0_5, %c0_6] : memref<1x32x32xbf16, #tpu.memory_space<vmem>>, vector<1x32x32xbf16>
    %6 = vector.shape_cast %5 : vector<1x32x32xbf16> to vector<32x32xbf16>
    %cst = arith.constant dense<0.000000e+00> : vector<16x32xf32>
    %7 = tpu.matmul %4, %6, %cst {dimension_numbers = #tpu.dot_dimension_numbers<[1], [0], [0], [1], [0, 0, 1, 1], [], []>} : vector<16x32xbf16>, vector<32x32xbf16>, vector<16x32xf32> -> vector<16x32xf32>
    %8 = arith.addf %3, %7 : vector<16x32xf32>
    %c0_7 = arith.constant 0 : index
    %c0_8 = arith.constant 0 : index
    %9 = vector.load %arg8[%c0_7, %c0_8] : memref<16x32xf32, #tpu.memory_space<vmem>>, vector<16x32xf32>
    tpu.vector_store %arg8[%c0_7, %c0_8], %8 {strides = array<i32>} : memref<16x32xf32, #tpu.memory_space<vmem>>, vector<16x32xf32>,
    %c0_i32_9 = arith.constant 0 : i32
    %10 = arith.cmpi eq, %arg3, %c0_i32_9 : i32
    %11 = arith.extui %10 : i1 to i32
    %c0_i32_10 = arith.constant 0 : i32
    %12 = arith.cmpi ne, %11, %c0_i32_10 : i32
    scf.if %12 {
      %c0_11 = arith.constant 0 : index
      %c0_12 = arith.constant 0 : index
      %13 = vector.load %arg8[%c0_11, %c0_12] : memref<16x32xf32, #tpu.memory_space<vmem>>, vector<16x32xf32>
      %c0_13 = arith.constant 0 : index
      %c0_14 = arith.constant 0 : index
      %c0_15 = arith.constant 0 : index
      %14 = vector.load %arg6[%c0_13, %c0_14, %c0_15] : memref<1x1x32xf32, #tpu.memory_space<vmem>>, vector<1x1x32xf32>
      %15 = vector.shape_cast %14 : vector<1x1x32xf32> to vector<1x32xf32>
      %16 = vector.broadcast %15 : vector<1x32xf32> to vector<16x32xf32>
      %17 = arith.addf %13, %16 : vector<16x32xf32>
      %18 = arith.truncf %17 : vector<16x32xf32> to vector<16x32xbf16>
      %c0_16 = arith.constant 0 : index
      %c0_17 = arith.constant 0 : index
      %c0_18 = arith.constant 0 : index
      %19 = vector.load %arg7[%c0_16, %c0_17, %c0_18] : memref<1x16x32xbf16, #tpu.memory_space<vmem>>, vector<1x16x32xbf16>
      %20 = vector.shape_cast %19 : vector<1x16x32xbf16> to vector<16x32xbf16>
      %21 = vector.shape_cast %18 : vector<16x32xbf16> to vector<1x16x32xbf16>
      tpu.vector_store %arg7[%c0_16, %c0_17, %c0_18], %21 {strides = array<i32>} : memref<1x16x32xbf16, #tpu.memory_space<vmem>>, vector<1x16x32xbf16>,
    } else {
    }
    return
  }
  func.func @transform_0(%arg0: i32, %arg1: i32, %arg2: i32, %arg3: i32) -> (i32, i32) {
    %c0_i32 = arith.constant 0 : i32
    return %arg1, %arg3 : i32, i32
  }
  func.func @transform_1(%arg0: i32, %arg1: i32, %arg2: i32, %arg3: i32) -> (i32, i32, i32) {
    %c0_i32 = arith.constant 0 : i32
    return %arg0, %arg3, %arg2 : i32, i32, i32
  }
  func.func @transform_2(%arg0: i32, %arg1: i32, %arg2: i32, %arg3: i32) -> (i32, i32, i32) {
    %c0_i32 = arith.constant 0 : i32
    %c0_i32_0 = arith.constant 0 : i32
    return %arg0, %c0_i32, %arg2 : i32, i32, i32
  }
  func.func @transform_3(%arg0: i32, %arg1: i32, %arg2: i32, %arg3: i32) -> (i32, i32, i32) {
    %c0_i32 = arith.constant 0 : i32
    return %arg0, %arg1, %arg2 : i32, i32, i32
  }
}

module attributes {stable_mosaic.version = 11 : i64} {
  func.func @_flash_rope_attn_kernel(%arg0: i32, %arg1: i32, %arg2: i32, %arg3: memref<1x1x8x32xbf16, #tpu.memory_space<vmem>>, %arg4: memref<1x1x8x32xbf16, #tpu.memory_space<vmem>>, %arg5: memref<1x1x8x32xbf16, #tpu.memory_space<vmem>>, %arg6: memref<8x32xbf16, #tpu.memory_space<vmem>>, %arg7: memref<8x32xbf16, #tpu.memory_space<vmem>>, %arg8: memref<8x32xbf16, #tpu.memory_space<vmem>>, %arg9: memref<8x32xbf16, #tpu.memory_space<vmem>>, %arg10: memref<32x32xbf16, #tpu.memory_space<vmem>>, %arg11: memref<1x32xf32, #tpu.memory_space<vmem>>, %arg12: memref<1x8x32xf32, #tpu.memory_space<vmem>>, %arg13: memref<8x32xbf16, #tpu.memory_space<vmem>>, %arg14: memref<8x4xf32, #tpu.memory_space<vmem>>, %arg15: memref<8x4xf32, #tpu.memory_space<vmem>>, %arg16: memref<8x32xf32, #tpu.memory_space<vmem>>) attributes {dimension_semantics = [#tpu.dimension_semantics<parallel>, #tpu.dimension_semantics<parallel>, #tpu.dimension_semantics<arbitrary>], iteration_bounds = array<i64: 2, 1, 1>, scalar_prefetch = 0 : i64, scratch_operands = 4 : i64, tpu.core_type = #tpu.core_type<tc>, window_params = [{transform_indices = @transform_0, window_bounds = array<i64: 1, 1, 8, 32>}, {transform_indices = @transform_1, window_bounds = array<i64: 1, 1, 8, 32>}, {transform_indices = @transform_2, window_bounds = array<i64: 1, 1, 8, 32>}, {transform_indices = @transform_3, window_bounds = array<i64: 8, 32>}, {transform_indices = @transform_4, window_bounds = array<i64: 8, 32>}, {transform_indices = @transform_5, window_bounds = array<i64: 8, 32>}, {transform_indices = @transform_6, window_bounds = array<i64: 8, 32>}, {pipeline_mode = #tpu.pipeline_mode<synchronous>, transform_indices = @transform_7, window_bounds = array<i64: 32, 32>}, {pipeline_mode = #tpu.pipeline_mode<synchronous>, transform_indices = @transform_8, window_bounds = array<i64: 1, 32>}, {transform_indices = @transform_9, window_bounds = array<i64: 1, 8, 32>}]} {
    %c0_i32 = arith.constant 0 : i32
    %0 = arith.cmpi eq, %arg2, %c0_i32 : i32
    %1 = arith.extui %0 : i1 to i32
    %c0_i32_0 = arith.constant 0 : i32
    %2 = arith.cmpi ne, %1, %c0_i32_0 : i32
    scf.if %2 {
      %c0_83 = arith.constant 0 : index
      %c0_84 = arith.constant 0 : index
      %c0_85 = arith.constant 0 : index
      %c0_86 = arith.constant 0 : index
      %144 = vector.load %arg3[%c0_83, %c0_84, %c0_85, %c0_86] : memref<1x1x8x32xbf16, #tpu.memory_space<vmem>>, vector<1x1x8x32xbf16>
      %145 = vector.shape_cast %144 : vector<1x1x8x32xbf16> to vector<8x32xbf16>
      %146 = arith.extf %145 : vector<8x32xbf16> to vector<8x32xf32>
      %c0_87 = arith.constant 0 : index
      %c0_88 = arith.constant 0 : index
      %147 = vector.load %arg6[%c0_87, %c0_88] : memref<8x32xbf16, #tpu.memory_space<vmem>>, vector<8x32xbf16>
      %148 = arith.extf %147 : vector<8x32xbf16> to vector<8x32xf32>
      %c0_89 = arith.constant 0 : index
      %c0_90 = arith.constant 0 : index
      %149 = vector.load %arg7[%c0_89, %c0_90] : memref<8x32xbf16, #tpu.memory_space<vmem>>, vector<8x32xbf16>
      %150 = arith.extf %149 : vector<8x32xbf16> to vector<8x32xf32>
      %151 = vector.extract_strided_slice %146 {offsets = [0, 0], sizes = [8, 4], strides = [1, 1]} : vector<8x32xf32> to vector<8x4xf32>
      %152 = vector.extract_strided_slice %146 {offsets = [0, 4], sizes = [8, 4], strides = [1, 1]} : vector<8x32xf32> to vector<8x4xf32>
      %cst_91 = arith.constant 0.000000e+00 : f32
      %153 = vector.broadcast %cst_91 : f32 to vector<8x4xf32>
      %154 = arith.subf %153, %152 : vector<8x4xf32>
      %155 = vector.extract_strided_slice %146 {offsets = [0, 8], sizes = [8, 4], strides = [1, 1]} : vector<8x32xf32> to vector<8x4xf32>
      %156 = vector.extract_strided_slice %146 {offsets = [0, 12], sizes = [8, 4], strides = [1, 1]} : vector<8x32xf32> to vector<8x4xf32>
      %cst_92 = arith.constant 0.000000e+00 : f32
      %157 = vector.broadcast %cst_92 : f32 to vector<8x4xf32>
      %158 = arith.subf %157, %156 : vector<8x4xf32>
      %159 = vector.extract_strided_slice %146 {offsets = [0, 16], sizes = [8, 4], strides = [1, 1]} : vector<8x32xf32> to vector<8x4xf32>
      %160 = vector.extract_strided_slice %146 {offsets = [0, 20], sizes = [8, 4], strides = [1, 1]} : vector<8x32xf32> to vector<8x4xf32>
      %cst_93 = arith.constant 0.000000e+00 : f32
      %161 = vector.broadcast %cst_93 : f32 to vector<8x4xf32>
      %162 = arith.subf %161, %160 : vector<8x4xf32>
      %163 = vector.extract_strided_slice %146 {offsets = [0, 24], sizes = [8, 4], strides = [1, 1]} : vector<8x32xf32> to vector<8x4xf32>
      %164 = vector.extract_strided_slice %146 {offsets = [0, 28], sizes = [8, 4], strides = [1, 1]} : vector<8x32xf32> to vector<8x4xf32>
      %cst_94 = arith.constant 0.000000e+00 : f32
      %165 = vector.broadcast %cst_94 : f32 to vector<8x4xf32>
      %166 = arith.subf %165, %164 : vector<8x4xf32>
      %167 = tpu.concatenate %154, %151, %158, %155, %162, %159, %166, %163 in 1 : vector<8x4xf32>, vector<8x4xf32>, vector<8x4xf32>, vector<8x4xf32>, vector<8x4xf32>, vector<8x4xf32>, vector<8x4xf32>, vector<8x4xf32> -> vector<8x32xf32>
      %168 = arith.mulf %146, %148 : vector<8x32xf32>
      %169 = arith.mulf %167, %150 : vector<8x32xf32>
      %170 = arith.addf %168, %169 : vector<8x32xf32>
      %cst_95 = arith.constant 0.353553385 : f32
      %171 = vector.broadcast %cst_95 : f32 to vector<8x32xf32>
      %172 = arith.mulf %170, %171 : vector<8x32xf32>
      %173 = arith.truncf %172 : vector<8x32xf32> to vector<8x32xbf16>
      %c0_96 = arith.constant 0 : index
      %c0_97 = arith.constant 0 : index
      %174 = vector.load %arg13[%c0_96, %c0_97] : memref<8x32xbf16, #tpu.memory_space<vmem>>, vector<8x32xbf16>
      tpu.vector_store %arg13[%c0_96, %c0_97], %173 {strides = array<i32>} : memref<8x32xbf16, #tpu.memory_space<vmem>>, vector<8x32xbf16>,
      %cst_98 = arith.constant 0xFF800000 : f32
      %175 = vector.broadcast %cst_98 : f32 to vector<8x4xf32>
      %c0_99 = arith.constant 0 : index
      %c0_100 = arith.constant 0 : index
      %176 = vector.load %arg14[%c0_99, %c0_100] : memref<8x4xf32, #tpu.memory_space<vmem>>, vector<8x4xf32>
      tpu.vector_store %arg14[%c0_99, %c0_100], %175 {strides = array<i32>} : memref<8x4xf32, #tpu.memory_space<vmem>>, vector<8x4xf32>,
      %cst_101 = arith.constant 0.000000e+00 : f32
      %177 = vector.broadcast %cst_101 : f32 to vector<8x4xf32>
      %c0_102 = arith.constant 0 : index
      %c0_103 = arith.constant 0 : index
      %178 = vector.load %arg15[%c0_102, %c0_103] : memref<8x4xf32, #tpu.memory_space<vmem>>, vector<8x4xf32>
      tpu.vector_store %arg15[%c0_102, %c0_103], %177 {strides = array<i32>} : memref<8x4xf32, #tpu.memory_space<vmem>>, vector<8x4xf32>,
      %cst_104 = arith.constant 0.000000e+00 : f32
      %179 = vector.broadcast %cst_104 : f32 to vector<8x32xf32>
      %c0_105 = arith.constant 0 : index
      %c0_106 = arith.constant 0 : index
      %180 = vector.load %arg16[%c0_105, %c0_106] : memref<8x32xf32, #tpu.memory_space<vmem>>, vector<8x32xf32>
      tpu.vector_store %arg16[%c0_105, %c0_106], %179 {strides = array<i32>} : memref<8x32xf32, #tpu.memory_space<vmem>>, vector<8x32xf32>,
    } else {
    }
    %c0 = arith.constant 0 : index
    %c0_1 = arith.constant 0 : index
    %c0_2 = arith.constant 0 : index
    %c0_3 = arith.constant 0 : index
    %3 = vector.load %arg4[%c0, %c0_1, %c0_2, %c0_3] : memref<1x1x8x32xbf16, #tpu.memory_space<vmem>>, vector<1x1x8x32xbf16>
    %4 = vector.shape_cast %3 : vector<1x1x8x32xbf16> to vector<8x32xbf16>
    %5 = arith.extf %4 : vector<8x32xbf16> to vector<8x32xf32>
    %c0_4 = arith.constant 0 : index
    %c0_5 = arith.constant 0 : index
    %6 = vector.load %arg8[%c0_4, %c0_5] : memref<8x32xbf16, #tpu.memory_space<vmem>>, vector<8x32xbf16>
    %7 = arith.extf %6 : vector<8x32xbf16> to vector<8x32xf32>
    %c0_6 = arith.constant 0 : index
    %c0_7 = arith.constant 0 : index
    %8 = vector.load %arg9[%c0_6, %c0_7] : memref<8x32xbf16, #tpu.memory_space<vmem>>, vector<8x32xbf16>
    %9 = arith.extf %8 : vector<8x32xbf16> to vector<8x32xf32>
    %10 = vector.extract_strided_slice %5 {offsets = [0, 0], sizes = [8, 4], strides = [1, 1]} : vector<8x32xf32> to vector<8x4xf32>
    %11 = vector.extract_strided_slice %5 {offsets = [0, 4], sizes = [8, 4], strides = [1, 1]} : vector<8x32xf32> to vector<8x4xf32>
    %cst = arith.constant 0.000000e+00 : f32
    %12 = vector.broadcast %cst : f32 to vector<8x4xf32>
    %13 = arith.subf %12, %11 : vector<8x4xf32>
    %14 = vector.extract_strided_slice %5 {offsets = [0, 8], sizes = [8, 4], strides = [1, 1]} : vector<8x32xf32> to vector<8x4xf32>
    %15 = vector.extract_strided_slice %5 {offsets = [0, 12], sizes = [8, 4], strides = [1, 1]} : vector<8x32xf32> to vector<8x4xf32>
    %cst_8 = arith.constant 0.000000e+00 : f32
    %16 = vector.broadcast %cst_8 : f32 to vector<8x4xf32>
    %17 = arith.subf %16, %15 : vector<8x4xf32>
    %18 = vector.extract_strided_slice %5 {offsets = [0, 16], sizes = [8, 4], strides = [1, 1]} : vector<8x32xf32> to vector<8x4xf32>
    %19 = vector.extract_strided_slice %5 {offsets = [0, 20], sizes = [8, 4], strides = [1, 1]} : vector<8x32xf32> to vector<8x4xf32>
    %cst_9 = arith.constant 0.000000e+00 : f32
    %20 = vector.broadcast %cst_9 : f32 to vector<8x4xf32>
    %21 = arith.subf %20, %19 : vector<8x4xf32>
    %22 = vector.extract_strided_slice %5 {offsets = [0, 24], sizes = [8, 4], strides = [1, 1]} : vector<8x32xf32> to vector<8x4xf32>
    %23 = vector.extract_strided_slice %5 {offsets = [0, 28], sizes = [8, 4], strides = [1, 1]} : vector<8x32xf32> to vector<8x4xf32>
    %cst_10 = arith.constant 0.000000e+00 : f32
    %24 = vector.broadcast %cst_10 : f32 to vector<8x4xf32>
    %25 = arith.subf %24, %23 : vector<8x4xf32>
    %26 = tpu.concatenate %13, %10, %17, %14, %21, %18, %25, %22 in 1 : vector<8x4xf32>, vector<8x4xf32>, vector<8x4xf32>, vector<8x4xf32>, vector<8x4xf32>, vector<8x4xf32>, vector<8x4xf32>, vector<8x4xf32> -> vector<8x32xf32>
    %27 = arith.mulf %5, %7 : vector<8x32xf32>
    %28 = arith.mulf %26, %9 : vector<8x32xf32>
    %29 = arith.addf %27, %28 : vector<8x32xf32>
    %30 = arith.truncf %29 : vector<8x32xf32> to vector<8x32xbf16>
    %c0_11 = arith.constant 0 : index
    %c0_12 = arith.constant 0 : index
    %c0_13 = arith.constant 0 : index
    %c0_14 = arith.constant 0 : index
    %31 = vector.load %arg5[%c0_11, %c0_12, %c0_13, %c0_14] : memref<1x1x8x32xbf16, #tpu.memory_space<vmem>>, vector<1x1x8x32xbf16>
    %32 = vector.shape_cast %31 : vector<1x1x8x32xbf16> to vector<8x32xbf16>
    %c0_15 = arith.constant 0 : index
    %c0_16 = arith.constant 0 : index
    %33 = vector.load %arg13[%c0_15, %c0_16] : memref<8x32xbf16, #tpu.memory_space<vmem>>, vector<8x8xbf16>
    %34 = vector.extract_strided_slice %30 {offsets = [0, 0], sizes = [8, 8], strides = [1, 1]} : vector<8x32xbf16> to vector<8x8xbf16>
    %cst_17 = arith.constant dense<0.000000e+00> : vector<8x8xf32>
    %35 = tpu.matmul %33, %34, %cst_17 {dimension_numbers = #tpu.dot_dimension_numbers<[1], [1], [0], [0], [0, 0, 1, 0], [], []>} : vector<8x8xbf16>, vector<8x8xbf16>, vector<8x8xf32> -> vector<8x8xf32>
    %c0_18 = arith.constant 0 : index
    %c0_19 = arith.constant 0 : index
    %36 = vector.load %arg14[%c0_18, %c0_19] : memref<8x4xf32, #tpu.memory_space<vmem>>, vector<8x1xf32>
    %cst_20 = arith.constant dense<0xFF800000> : vector<8xf32>
    %37 = vector.multi_reduction <maximumf>, %35, %cst_20 [1] : vector<8x8xf32> to vector<8xf32>
    %38 = vector.shape_cast %37 : vector<8xf32> to vector<8x1xf32>
    %39 = arith.maximumf %36, %38 : vector<8x1xf32>
    %40 = arith.subf %36, %39 : vector<8x1xf32>
    %41 = math.exp %40 : vector<8x1xf32>
    %42 = vector.broadcast %39 : vector<8x1xf32> to vector<8x8xf32>
    %43 = arith.subf %35, %42 : vector<8x8xf32>
    %44 = math.exp %43 : vector<8x8xf32>
    %c0_21 = arith.constant 0 : index
    %c0_22 = arith.constant 0 : index
    %45 = vector.load %arg15[%c0_21, %c0_22] : memref<8x4xf32, #tpu.memory_space<vmem>>, vector<8x1xf32>
    %46 = arith.mulf %41, %45 : vector<8x1xf32>
    %cst_23 = arith.constant dense<0.000000e+00> : vector<8xf32>
    %47 = vector.multi_reduction <add>, %44, %cst_23 [1] : vector<8x8xf32> to vector<8xf32>
    %48 = vector.shape_cast %47 : vector<8xf32> to vector<8x1xf32>
    %49 = arith.addf %46, %48 : vector<8x1xf32>
    %c0_24 = arith.constant 0 : index
    %c0_25 = arith.constant 0 : index
    %50 = vector.load %arg15[%c0_24, %c0_25] : memref<8x4xf32, #tpu.memory_space<vmem>>, vector<8x1xf32>
    tpu.vector_store %arg15[%c0_24, %c0_25], %49 {strides = array<i32>} : memref<8x4xf32, #tpu.memory_space<vmem>>, vector<8x1xf32>,
    %c0_26 = arith.constant 0 : index
    %c0_27 = arith.constant 0 : index
    %51 = vector.load %arg14[%c0_26, %c0_27] : memref<8x4xf32, #tpu.memory_space<vmem>>, vector<8x1xf32>
    tpu.vector_store %arg14[%c0_26, %c0_27], %39 {strides = array<i32>} : memref<8x4xf32, #tpu.memory_space<vmem>>, vector<8x1xf32>,
    %c0_28 = arith.constant 0 : index
    %c0_29 = arith.constant 0 : index
    %52 = vector.load %arg16[%c0_28, %c0_29] : memref<8x32xf32, #tpu.memory_space<vmem>>, vector<8x8xf32>
    %53 = vector.broadcast %41 : vector<8x1xf32> to vector<8x8xf32>
    %54 = arith.mulf %53, %52 : vector<8x8xf32>
    %55 = arith.truncf %44 : vector<8x8xf32> to vector<8x8xbf16>
    %56 = vector.extract_strided_slice %32 {offsets = [0, 0], sizes = [8, 8], strides = [1, 1]} : vector<8x32xbf16> to vector<8x8xbf16>
    %cst_30 = arith.constant dense<0.000000e+00> : vector<8x8xf32>
    %57 = tpu.matmul %55, %56, %cst_30 {dimension_numbers = #tpu.dot_dimension_numbers<[1], [0], [0], [1], [0, 0, 1, 1], [], []>} : vector<8x8xbf16>, vector<8x8xbf16>, vector<8x8xf32> -> vector<8x8xf32>
    %58 = arith.addf %54, %57 : vector<8x8xf32>
    %c0_31 = arith.constant 0 : index
    %c0_32 = arith.constant 0 : index
    %59 = vector.load %arg16[%c0_31, %c0_32] : memref<8x32xf32, #tpu.memory_space<vmem>>, vector<8x8xf32>
    tpu.vector_store %arg16[%c0_31, %c0_32], %58 {strides = array<i32>} : memref<8x32xf32, #tpu.memory_space<vmem>>, vector<8x8xf32>,
    %c0_33 = arith.constant 0 : index
    %c8 = arith.constant 8 : index
    %60 = vector.load %arg13[%c0_33, %c8] : memref<8x32xbf16, #tpu.memory_space<vmem>>, vector<8x8xbf16>
    %61 = vector.extract_strided_slice %30 {offsets = [0, 8], sizes = [8, 8], strides = [1, 1]} : vector<8x32xbf16> to vector<8x8xbf16>
    %cst_34 = arith.constant dense<0.000000e+00> : vector<8x8xf32>
    %62 = tpu.matmul %60, %61, %cst_34 {dimension_numbers = #tpu.dot_dimension_numbers<[1], [1], [0], [0], [0, 0, 1, 0], [], []>} : vector<8x8xbf16>, vector<8x8xbf16>, vector<8x8xf32> -> vector<8x8xf32>
    %c0_35 = arith.constant 0 : index
    %c1 = arith.constant 1 : index
    %63 = vector.load %arg14[%c0_35, %c1] : memref<8x4xf32, #tpu.memory_space<vmem>>, vector<8x1xf32>
    %cst_36 = arith.constant dense<0xFF800000> : vector<8xf32>
    %64 = vector.multi_reduction <maximumf>, %62, %cst_36 [1] : vector<8x8xf32> to vector<8xf32>
    %65 = vector.shape_cast %64 : vector<8xf32> to vector<8x1xf32>
    %66 = arith.maximumf %63, %65 : vector<8x1xf32>
    %67 = arith.subf %63, %66 : vector<8x1xf32>
    %68 = math.exp %67 : vector<8x1xf32>
    %69 = vector.broadcast %66 : vector<8x1xf32> to vector<8x8xf32>
    %70 = arith.subf %62, %69 : vector<8x8xf32>
    %71 = math.exp %70 : vector<8x8xf32>
    %c0_37 = arith.constant 0 : index
    %c1_38 = arith.constant 1 : index
    %72 = vector.load %arg15[%c0_37, %c1_38] : memref<8x4xf32, #tpu.memory_space<vmem>>, vector<8x1xf32>
    %73 = arith.mulf %68, %72 : vector<8x1xf32>
    %cst_39 = arith.constant dense<0.000000e+00> : vector<8xf32>
    %74 = vector.multi_reduction <add>, %71, %cst_39 [1] : vector<8x8xf32> to vector<8xf32>
    %75 = vector.shape_cast %74 : vector<8xf32> to vector<8x1xf32>
    %76 = arith.addf %73, %75 : vector<8x1xf32>
    %c0_40 = arith.constant 0 : index
    %c1_41 = arith.constant 1 : index
    %77 = vector.load %arg15[%c0_40, %c1_41] : memref<8x4xf32, #tpu.memory_space<vmem>>, vector<8x1xf32>
    tpu.vector_store %arg15[%c0_40, %c1_41], %76 {strides = array<i32>} : memref<8x4xf32, #tpu.memory_space<vmem>>, vector<8x1xf32>,
    %c0_42 = arith.constant 0 : index
    %c1_43 = arith.constant 1 : index
    %78 = vector.load %arg14[%c0_42, %c1_43] : memref<8x4xf32, #tpu.memory_space<vmem>>, vector<8x1xf32>
    tpu.vector_store %arg14[%c0_42, %c1_43], %66 {strides = array<i32>} : memref<8x4xf32, #tpu.memory_space<vmem>>, vector<8x1xf32>,
    %c0_44 = arith.constant 0 : index
    %c8_45 = arith.constant 8 : index
    %79 = vector.load %arg16[%c0_44, %c8_45] : memref<8x32xf32, #tpu.memory_space<vmem>>, vector<8x8xf32>
    %80 = vector.broadcast %68 : vector<8x1xf32> to vector<8x8xf32>
    %81 = arith.mulf %80, %79 : vector<8x8xf32>
    %82 = arith.truncf %71 : vector<8x8xf32> to vector<8x8xbf16>
    %83 = vector.extract_strided_slice %32 {offsets = [0, 8], sizes = [8, 8], strides = [1, 1]} : vector<8x32xbf16> to vector<8x8xbf16>
    %cst_46 = arith.constant dense<0.000000e+00> : vector<8x8xf32>
    %84 = tpu.matmul %82, %83, %cst_46 {dimension_numbers = #tpu.dot_dimension_numbers<[1], [0], [0], [1], [0, 0, 1, 1], [], []>} : vector<8x8xbf16>, vector<8x8xbf16>, vector<8x8xf32> -> vector<8x8xf32>
    %85 = arith.addf %81, %84 : vector<8x8xf32>
    %c0_47 = arith.constant 0 : index
    %c8_48 = arith.constant 8 : index
    %86 = vector.load %arg16[%c0_47, %c8_48] : memref<8x32xf32, #tpu.memory_space<vmem>>, vector<8x8xf32>
    tpu.vector_store %arg16[%c0_47, %c8_48], %85 {strides = array<i32>} : memref<8x32xf32, #tpu.memory_space<vmem>>, vector<8x8xf32>,
    %c0_49 = arith.constant 0 : index
    %c16 = arith.constant 16 : index
    %87 = vector.load %arg13[%c0_49, %c16] : memref<8x32xbf16, #tpu.memory_space<vmem>>, vector<8x8xbf16>
    %88 = vector.extract_strided_slice %30 {offsets = [0, 16], sizes = [8, 8], strides = [1, 1]} : vector<8x32xbf16> to vector<8x8xbf16>
    %cst_50 = arith.constant dense<0.000000e+00> : vector<8x8xf32>
    %89 = tpu.matmul %87, %88, %cst_50 {dimension_numbers = #tpu.dot_dimension_numbers<[1], [1], [0], [0], [0, 0, 1, 0], [], []>} : vector<8x8xbf16>, vector<8x8xbf16>, vector<8x8xf32> -> vector<8x8xf32>
    %c0_51 = arith.constant 0 : index
    %c2 = arith.constant 2 : index
    %90 = vector.load %arg14[%c0_51, %c2] : memref<8x4xf32, #tpu.memory_space<vmem>>, vector<8x1xf32>
    %cst_52 = arith.constant dense<0xFF800000> : vector<8xf32>
    %91 = vector.multi_reduction <maximumf>, %89, %cst_52 [1] : vector<8x8xf32> to vector<8xf32>
    %92 = vector.shape_cast %91 : vector<8xf32> to vector<8x1xf32>
    %93 = arith.maximumf %90, %92 : vector<8x1xf32>
    %94 = arith.subf %90, %93 : vector<8x1xf32>
    %95 = math.exp %94 : vector<8x1xf32>
    %96 = vector.broadcast %93 : vector<8x1xf32> to vector<8x8xf32>
    %97 = arith.subf %89, %96 : vector<8x8xf32>
    %98 = math.exp %97 : vector<8x8xf32>
    %c0_53 = arith.constant 0 : index
    %c2_54 = arith.constant 2 : index
    %99 = vector.load %arg15[%c0_53, %c2_54] : memref<8x4xf32, #tpu.memory_space<vmem>>, vector<8x1xf32>
    %100 = arith.mulf %95, %99 : vector<8x1xf32>
    %cst_55 = arith.constant dense<0.000000e+00> : vector<8xf32>
    %101 = vector.multi_reduction <add>, %98, %cst_55 [1] : vector<8x8xf32> to vector<8xf32>
    %102 = vector.shape_cast %101 : vector<8xf32> to vector<8x1xf32>
    %103 = arith.addf %100, %102 : vector<8x1xf32>
    %c0_56 = arith.constant 0 : index
    %c2_57 = arith.constant 2 : index
    %104 = vector.load %arg15[%c0_56, %c2_57] : memref<8x4xf32, #tpu.memory_space<vmem>>, vector<8x1xf32>
    tpu.vector_store %arg15[%c0_56, %c2_57], %103 {strides = array<i32>} : memref<8x4xf32, #tpu.memory_space<vmem>>, vector<8x1xf32>,
    %c0_58 = arith.constant 0 : index
    %c2_59 = arith.constant 2 : index
    %105 = vector.load %arg14[%c0_58, %c2_59] : memref<8x4xf32, #tpu.memory_space<vmem>>, vector<8x1xf32>
    tpu.vector_store %arg14[%c0_58, %c2_59], %93 {strides = array<i32>} : memref<8x4xf32, #tpu.memory_space<vmem>>, vector<8x1xf32>,
    %c0_60 = arith.constant 0 : index
    %c16_61 = arith.constant 16 : index
    %106 = vector.load %arg16[%c0_60, %c16_61] : memref<8x32xf32, #tpu.memory_space<vmem>>, vector<8x8xf32>
    %107 = vector.broadcast %95 : vector<8x1xf32> to vector<8x8xf32>
    %108 = arith.mulf %107, %106 : vector<8x8xf32>
    %109 = arith.truncf %98 : vector<8x8xf32> to vector<8x8xbf16>
    %110 = vector.extract_strided_slice %32 {offsets = [0, 16], sizes = [8, 8], strides = [1, 1]} : vector<8x32xbf16> to vector<8x8xbf16>
    %cst_62 = arith.constant dense<0.000000e+00> : vector<8x8xf32>
    %111 = tpu.matmul %109, %110, %cst_62 {dimension_numbers = #tpu.dot_dimension_numbers<[1], [0], [0], [1], [0, 0, 1, 1], [], []>} : vector<8x8xbf16>, vector<8x8xbf16>, vector<8x8xf32> -> vector<8x8xf32>
    %112 = arith.addf %108, %111 : vector<8x8xf32>
    %c0_63 = arith.constant 0 : index
    %c16_64 = arith.constant 16 : index
    %113 = vector.load %arg16[%c0_63, %c16_64] : memref<8x32xf32, #tpu.memory_space<vmem>>, vector<8x8xf32>
    tpu.vector_store %arg16[%c0_63, %c16_64], %112 {strides = array<i32>} : memref<8x32xf32, #tpu.memory_space<vmem>>, vector<8x8xf32>,
    %c0_65 = arith.constant 0 : index
    %c24 = arith.constant 24 : index
    %114 = vector.load %arg13[%c0_65, %c24] : memref<8x32xbf16, #tpu.memory_space<vmem>>, vector<8x8xbf16>
    %115 = vector.extract_strided_slice %30 {offsets = [0, 24], sizes = [8, 8], strides = [1, 1]} : vector<8x32xbf16> to vector<8x8xbf16>
    %cst_66 = arith.constant dense<0.000000e+00> : vector<8x8xf32>
    %116 = tpu.matmul %114, %115, %cst_66 {dimension_numbers = #tpu.dot_dimension_numbers<[1], [1], [0], [0], [0, 0, 1, 0], [], []>} : vector<8x8xbf16>, vector<8x8xbf16>, vector<8x8xf32> -> vector<8x8xf32>
    %c0_67 = arith.constant 0 : index
    %c3 = arith.constant 3 : index
    %117 = vector.load %arg14[%c0_67, %c3] : memref<8x4xf32, #tpu.memory_space<vmem>>, vector<8x1xf32>
    %cst_68 = arith.constant dense<0xFF800000> : vector<8xf32>
    %118 = vector.multi_reduction <maximumf>, %116, %cst_68 [1] : vector<8x8xf32> to vector<8xf32>
    %119 = vector.shape_cast %118 : vector<8xf32> to vector<8x1xf32>
    %120 = arith.maximumf %117, %119 : vector<8x1xf32>
    %121 = arith.subf %117, %120 : vector<8x1xf32>
    %122 = math.exp %121 : vector<8x1xf32>
    %123 = vector.broadcast %120 : vector<8x1xf32> to vector<8x8xf32>
    %124 = arith.subf %116, %123 : vector<8x8xf32>
    %125 = math.exp %124 : vector<8x8xf32>
    %c0_69 = arith.constant 0 : index
    %c3_70 = arith.constant 3 : index
    %126 = vector.load %arg15[%c0_69, %c3_70] : memref<8x4xf32, #tpu.memory_space<vmem>>, vector<8x1xf32>
    %127 = arith.mulf %122, %126 : vector<8x1xf32>
    %cst_71 = arith.constant dense<0.000000e+00> : vector<8xf32>
    %128 = vector.multi_reduction <add>, %125, %cst_71 [1] : vector<8x8xf32> to vector<8xf32>
    %129 = vector.shape_cast %128 : vector<8xf32> to vector<8x1xf32>
    %130 = arith.addf %127, %129 : vector<8x1xf32>
    %c0_72 = arith.constant 0 : index
    %c3_73 = arith.constant 3 : index
    %131 = vector.load %arg15[%c0_72, %c3_73] : memref<8x4xf32, #tpu.memory_space<vmem>>, vector<8x1xf32>
    tpu.vector_store %arg15[%c0_72, %c3_73], %130 {strides = array<i32>} : memref<8x4xf32, #tpu.memory_space<vmem>>, vector<8x1xf32>,
    %c0_74 = arith.constant 0 : index
    %c3_75 = arith.constant 3 : index
    %132 = vector.load %arg14[%c0_74, %c3_75] : memref<8x4xf32, #tpu.memory_space<vmem>>, vector<8x1xf32>
    tpu.vector_store %arg14[%c0_74, %c3_75], %120 {strides = array<i32>} : memref<8x4xf32, #tpu.memory_space<vmem>>, vector<8x1xf32>,
    %c0_76 = arith.constant 0 : index
    %c24_77 = arith.constant 24 : index
    %133 = vector.load %arg16[%c0_76, %c24_77] : memref<8x32xf32, #tpu.memory_space<vmem>>, vector<8x8xf32>
    %134 = vector.broadcast %122 : vector<8x1xf32> to vector<8x8xf32>
    %135 = arith.mulf %134, %133 : vector<8x8xf32>
    %136 = arith.truncf %125 : vector<8x8xf32> to vector<8x8xbf16>
    %137 = vector.extract_strided_slice %32 {offsets = [0, 24], sizes = [8, 8], strides = [1, 1]} : vector<8x32xbf16> to vector<8x8xbf16>
    %cst_78 = arith.constant dense<0.000000e+00> : vector<8x8xf32>
    %138 = tpu.matmul %136, %137, %cst_78 {dimension_numbers = #tpu.dot_dimension_numbers<[1], [0], [0], [1], [0, 0, 1, 1], [], []>} : vector<8x8xbf16>, vector<8x8xbf16>, vector<8x8xf32> -> vector<8x8xf32>
    %139 = arith.addf %135, %138 : vector<8x8xf32>
    %c0_79 = arith.constant 0 : index
    %c24_80 = arith.constant 24 : index
    %140 = vector.load %arg16[%c0_79, %c24_80] : memref<8x32xf32, #tpu.memory_space<vmem>>, vector<8x8xf32>
    tpu.vector_store %arg16[%c0_79, %c24_80], %139 {strides = array<i32>} : memref<8x32xf32, #tpu.memory_space<vmem>>, vector<8x8xf32>,
    %c0_i32_81 = arith.constant 0 : i32
    %141 = arith.cmpi eq, %arg2, %c0_i32_81 : i32
    %142 = arith.extui %141 : i1 to i32
    %c0_i32_82 = arith.constant 0 : i32
    %143 = arith.cmpi ne, %142, %c0_i32_82 : i32
    scf.if %143 {
      %c0_83 = arith.constant 0 : index
      %c0_84 = arith.constant 0 : index
      %144 = vector.load %arg16[%c0_83, %c0_84] : memref<8x32xf32, #tpu.memory_space<vmem>>, vector<8x8xf32>
      %c0_85 = arith.constant 0 : index
      %c0_86 = arith.constant 0 : index
      %145 = vector.load %arg15[%c0_85, %c0_86] : memref<8x4xf32, #tpu.memory_space<vmem>>, vector<8x1xf32>
      %146 = tpu.reciprocal %145 {approx = true} : vector<8x1xf32> -> vector<8x1xf32>
      %147 = vector.broadcast %146 : vector<8x1xf32> to vector<8x8xf32>
      %148 = arith.mulf %144, %147 : vector<8x8xf32>
      %c0_87 = arith.constant 0 : index
      %c0_88 = arith.constant 0 : index
      %149 = vector.load %arg16[%c0_87, %c0_88] : memref<8x32xf32, #tpu.memory_space<vmem>>, vector<8x8xf32>
      tpu.vector_store %arg16[%c0_87, %c0_88], %148 {strides = array<i32>} : memref<8x32xf32, #tpu.memory_space<vmem>>, vector<8x8xf32>,
      %c0_89 = arith.constant 0 : index
      %c8_90 = arith.constant 8 : index
      %150 = vector.load %arg16[%c0_89, %c8_90] : memref<8x32xf32, #tpu.memory_space<vmem>>, vector<8x8xf32>
      %c0_91 = arith.constant 0 : index
      %c1_92 = arith.constant 1 : index
      %151 = vector.load %arg15[%c0_91, %c1_92] : memref<8x4xf32, #tpu.memory_space<vmem>>, vector<8x1xf32>
      %152 = tpu.reciprocal %151 {approx = true} : vector<8x1xf32> -> vector<8x1xf32>
      %153 = vector.broadcast %152 : vector<8x1xf32> to vector<8x8xf32>
      %154 = arith.mulf %150, %153 : vector<8x8xf32>
      %c0_93 = arith.constant 0 : index
      %c8_94 = arith.constant 8 : index
      %155 = vector.load %arg16[%c0_93, %c8_94] : memref<8x32xf32, #tpu.memory_space<vmem>>, vector<8x8xf32>
      tpu.vector_store %arg16[%c0_93, %c8_94], %154 {strides = array<i32>} : memref<8x32xf32, #tpu.memory_space<vmem>>, vector<8x8xf32>,
      %c0_95 = arith.constant 0 : index
      %c16_96 = arith.constant 16 : index
      %156 = vector.load %arg16[%c0_95, %c16_96] : memref<8x32xf32, #tpu.memory_space<vmem>>, vector<8x8xf32>
      %c0_97 = arith.constant 0 : index
      %c2_98 = arith.constant 2 : index
      %157 = vector.load %arg15[%c0_97, %c2_98] : memref<8x4xf32, #tpu.memory_space<vmem>>, vector<8x1xf32>
      %158 = tpu.reciprocal %157 {approx = true} : vector<8x1xf32> -> vector<8x1xf32>
      %159 = vector.broadcast %158 : vector<8x1xf32> to vector<8x8xf32>
      %160 = arith.mulf %156, %159 : vector<8x8xf32>
      %c0_99 = arith.constant 0 : index
      %c16_100 = arith.constant 16 : index
      %161 = vector.load %arg16[%c0_99, %c16_100] : memref<8x32xf32, #tpu.memory_space<vmem>>, vector<8x8xf32>
      tpu.vector_store %arg16[%c0_99, %c16_100], %160 {strides = array<i32>} : memref<8x32xf32, #tpu.memory_space<vmem>>, vector<8x8xf32>,
      %c0_101 = arith.constant 0 : index
      %c24_102 = arith.constant 24 : index
      %162 = vector.load %arg16[%c0_101, %c24_102] : memref<8x32xf32, #tpu.memory_space<vmem>>, vector<8x8xf32>
      %c0_103 = arith.constant 0 : index
      %c3_104 = arith.constant 3 : index
      %163 = vector.load %arg15[%c0_103, %c3_104] : memref<8x4xf32, #tpu.memory_space<vmem>>, vector<8x1xf32>
      %164 = tpu.reciprocal %163 {approx = true} : vector<8x1xf32> -> vector<8x1xf32>
      %165 = vector.broadcast %164 : vector<8x1xf32> to vector<8x8xf32>
      %166 = arith.mulf %162, %165 : vector<8x8xf32>
      %c0_105 = arith.constant 0 : index
      %c24_106 = arith.constant 24 : index
      %167 = vector.load %arg16[%c0_105, %c24_106] : memref<8x32xf32, #tpu.memory_space<vmem>>, vector<8x8xf32>
      tpu.vector_store %arg16[%c0_105, %c24_106], %166 {strides = array<i32>} : memref<8x32xf32, #tpu.memory_space<vmem>>, vector<8x8xf32>,
      %c0_107 = arith.constant 0 : index
      %c0_108 = arith.constant 0 : index
      %168 = vector.load %arg16[%c0_107, %c0_108] : memref<8x32xf32, #tpu.memory_space<vmem>>, vector<8x32xf32>
      %169 = arith.truncf %168 : vector<8x32xf32> to vector<8x32xbf16>
      %c0_109 = arith.constant 0 : index
      %c0_110 = arith.constant 0 : index
      %170 = vector.load %arg10[%c0_109, %c0_110] : memref<32x32xbf16, #tpu.memory_space<vmem>>, vector<32x32xbf16>
      %cst_111 = arith.constant dense<0.000000e+00> : vector<8x32xf32>
      %171 = tpu.matmul %169, %170, %cst_111 {dimension_numbers = #tpu.dot_dimension_numbers<[1], [0], [0], [1], [0, 0, 1, 1], [], []>} : vector<8x32xbf16>, vector<32x32xbf16>, vector<8x32xf32> -> vector<8x32xf32>
      %c0_112 = arith.constant 0 : index
      %c0_113 = arith.constant 0 : index
      %172 = vector.load %arg11[%c0_112, %c0_113] : memref<1x32xf32, #tpu.memory_space<vmem>>, vector<1x32xf32>
      %173 = vector.broadcast %172 : vector<1x32xf32> to vector<8x32xf32>
      %174 = arith.addf %171, %173 : vector<8x32xf32>
      %c0_114 = arith.constant 0 : index
      %c0_115 = arith.constant 0 : index
      %c0_116 = arith.constant 0 : index
      %175 = vector.load %arg12[%c0_114, %c0_115, %c0_116] : memref<1x8x32xf32, #tpu.memory_space<vmem>>, vector<1x8x32xf32>
      %176 = vector.shape_cast %175 : vector<1x8x32xf32> to vector<8x32xf32>
      %177 = vector.shape_cast %174 : vector<8x32xf32> to vector<1x8x32xf32>
      tpu.vector_store %arg12[%c0_114, %c0_115, %c0_116], %177 {strides = array<i32>} : memref<1x8x32xf32, #tpu.memory_space<vmem>>, vector<1x8x32xf32>,
    } else {
    }
    return
  }
  func.func @transform_0(%arg0: i32, %arg1: i32, %arg2: i32) -> (i32, i32, i32, i32) {
    %c0_i32 = arith.constant 0 : i32
    %c0_i32_0 = arith.constant 0 : i32
    %c0_i32_1 = arith.constant 0 : i32
    return %c0_i32, %arg0, %arg1, %c0_i32_0 : i32, i32, i32, i32
  }
  func.func @transform_1(%arg0: i32, %arg1: i32, %arg2: i32) -> (i32, i32, i32, i32) {
    %c1_i32 = arith.constant 1 : i32
    %c0_i32 = arith.constant 0 : i32
    %c0_i32_0 = arith.constant 0 : i32
    return %c1_i32, %arg0, %arg2, %c0_i32 : i32, i32, i32, i32
  }
  func.func @transform_2(%arg0: i32, %arg1: i32, %arg2: i32) -> (i32, i32, i32, i32) {
    %c2_i32 = arith.constant 2 : i32
    %c0_i32 = arith.constant 0 : i32
    %c0_i32_0 = arith.constant 0 : i32
    return %c2_i32, %arg0, %arg2, %c0_i32 : i32, i32, i32, i32
  }
  func.func @transform_3(%arg0: i32, %arg1: i32, %arg2: i32) -> (i32, i32) {
    %c0_i32 = arith.constant 0 : i32
    %c0_i32_0 = arith.constant 0 : i32
    return %arg1, %c0_i32 : i32, i32
  }
  func.func @transform_4(%arg0: i32, %arg1: i32, %arg2: i32) -> (i32, i32) {
    %c0_i32 = arith.constant 0 : i32
    %c0_i32_0 = arith.constant 0 : i32
    return %arg1, %c0_i32 : i32, i32
  }
  func.func @transform_5(%arg0: i32, %arg1: i32, %arg2: i32) -> (i32, i32) {
    %c0_i32 = arith.constant 0 : i32
    %c0_i32_0 = arith.constant 0 : i32
    return %arg2, %c0_i32 : i32, i32
  }
  func.func @transform_6(%arg0: i32, %arg1: i32, %arg2: i32) -> (i32, i32) {
    %c0_i32 = arith.constant 0 : i32
    %c0_i32_0 = arith.constant 0 : i32
    return %arg2, %c0_i32 : i32, i32
  }
  func.func @transform_7(%arg0: i32, %arg1: i32, %arg2: i32) -> (i32, i32) {
    %c0_i32 = arith.constant 0 : i32
    %c0_i32_0 = arith.constant 0 : i32
    %c0_i32_1 = arith.constant 0 : i32
    return %c0_i32, %c0_i32_0 : i32, i32
  }
  func.func @transform_8(%arg0: i32, %arg1: i32, %arg2: i32) -> (i32, i32) {
    %c0_i32 = arith.constant 0 : i32
    %c0_i32_0 = arith.constant 0 : i32
    %c0_i32_1 = arith.constant 0 : i32
    return %c0_i32, %c0_i32_0 : i32, i32
  }
  func.func @transform_9(%arg0: i32, %arg1: i32, %arg2: i32) -> (i32, i32, i32) {
    %c0_i32 = arith.constant 0 : i32
    %c0_i32_0 = arith.constant 0 : i32
    return %arg0, %arg1, %c0_i32 : i32, i32, i32
  }
}

</mosaic_0001>

<bundles_post_ra>
// kernel: rotary_self_attention.2
= control target key start
LH: loop header
LB: loop body
LE: loop exit
PB: predicated region body
PF: predicated region fallthrough
CT: control target
= control target key end

     0   :  { %s653_s12 = smov 0   ;;  %s655_s13 = smov 0   ;;  %s697_s0 = inlined_call_operand.vmem [shape: bf16[16,32], index: 0, kind: input, shape index: {}]   ;;  %s698_s1 = inlined_call_operand.vmem [shape: bf16[3,32,32], index: 1, kind: input, shape index: {}]   ;;  %s699_s2 = inlined_call_operand.vmem [shape: f32[3,1,32], index: 2, kind: input, shape index: {}]   ;;  %s700_s3 = inlined_call_operand.vmem [shape: bf16[3,16,32], index: 3, kind: output, shape index: {}]  }
   0x1   :  { %s657_s14 = smov 0  }
   0x2 LB: > { %s39_s15 = sadd.s32 1, %s625_s13  ;;  %p549_p0 = scmp.ge.s32.totalorder %s629_s14, 1  ;;  %s629_s14 = sphi %s657_s14, %s13_s14   ;;  %s625_s13 = sphi %s655_s13, %s702_s13   ;;  %s621_s12 = sphi %s653_s12, %s701_s12  }
   0x3   : > { %p41_p1 = scmp.ge.s32.totalorder %s39_s15, 3  ;;  %p208_p2 = scmp.lt.s32.totalorder %s629_s14, 4 }
   0x5   : > { %s704_s15 = smov (%p41_p1, %s39_s15), 0  ;;  %p209_p3 = pnand %p549_p0, %p208_p2 }
   0x6   : > { %p270_p4 = scmp.lt.s32.totalorder (!%p209_p3), %s621_s12, 2  ;;  %vm306_vm0 = vcmask (!%p209_p3), 261120   ;;  %v631_v0 = vmov (!%p209_p3), 0.0   ;;  %vm632_vm1 = vmmov (!%p209_p3), 0   ;;  %v606_v3 = vld [vmem:[%s697_s0] sm:$0xff] (!%p209_p3)   ;;  %vm405_vm2 = vcmask (!%p209_p3), 257024  }
   0x7   : > { %212 = sbr.rel (%p209_p3) target bundleno = 254 (0xfe), region = 32  ;;  %570 = vmatprep.subr.bf16.mxu0 (!%p209_p3), %v631_v0  ;;  %574 = vmatprep.mubr.msk.bf16.mxu0 (!%p209_p3), %vm632_vm1, %v631_v0  ;;  %307 = vst.msk [vmem:[#allocation2] sm:$0xff] (!%p209_p3), %vm306_vm0, %v631_v0  ;;  %308 = vst.msk [vmem:[#allocation2 + $0x8] sm:$0xff] (!%p209_p3), %vm306_vm0, %v631_v0 }
   0xe   : > { %s706_s12 = smov (!%p270_p4, %s621_s12), 2  ;;  %v309_v4 = vld [vmem:[#allocation2] sm:$0xff]  ;;  %v310_v6 = vld [vmem:[#allocation2 + $0x8] sm:$0xff] }
   0xf   : > { %s563_s16 = sshll.u32 %s706_s12, 4  ;;  %s287_s24 = scalar_lea.vmem %s699_s2, %s706_s12 }
  0x10   : > { %s280_s19 = scalar_lea.vmem %s698_s1, %s563_s16  ;;  %v558_v12 = vld [vmem:[%s287_s24] ss:$0 sm:$0xff]  ;;  %s564_s25 = sshll.u32 %s706_s12, 3 }
  0x11   : > { %v604_v1 = vld [vmem:[%s280_s19] sm:$0xff]   ;;  %v605_v2 = vld [vmem:[%s280_s19 + $0x8] sm:$0xff]   ;;  %s299_s28 = scalar_lea.vmem %s700_s3, %s564_s25 }
  0x12   : > { %571 = vmatpush3.bf16.msra.mxu0 %v604_v1 }
  0x13   : > { %572 = vmatprep.subr.bf16.mxu0 %v631_v0 }
  0x16   : > { %573 = vmatpush3.bf16.msra.mxu0 %v605_v2 }
  0x19   : > { %575 = vmatmul.mubr.msk.bf16.vlgmr.msra.gmra.mrb[0].mxu0 %vm306_vm0, %v606_v3 }
  0xec   : > { %v372_v5 = vpop.f32.mrb[0].mxu0 }
  0xed   : > { %v379_v7 = vadd.f32 %v372_v5, %v309_v4  ;;  %v576_v8 = vpop.f32.mrb[1].mxu0 }
  0xee   : > { %v375_v9 = vpop.f32.mrb[2].mxu0 }
  0xef   : > { %381 = vst.msk [vmem:[#allocation2] sm:$0xff] %vm306_vm0, %v379_v7  ;;  %v380_v10 = vadd.f32 %v375_v9, %v310_v6  ;;  %v577_v11 = vpop.f32.mrb[3].mxu0 }
  0xf1   : > { %382 = vst.msk [vmem:[#allocation2 + $0x8] sm:$0xff] %vm306_vm0, %v380_v10 }
  0xf6   : > { %v386_v13 = vld [vmem:[#allocation2] sm:$0xff] }
  0xf7   : > { %v395_v14 = vadd.f32 %v558_v12, %v386_v13 }
  0xf8   : > { %v387_v15 = vld [vmem:[#allocation2 + $0x8] sm:$0xff] }
  0xf9   : > { %v565_v16 = vpack.c.bf16 %v395_v14, %v395_v14  ;;  %v396_v17 = vadd.f32 %v558_v12, %v387_v15 }
  0xfb   : > { %406 = vst.msk [vmem:[%s299_s28] sm:$0xf] %vm405_vm2, %v565_v16  ;;  %v566_v18 = vpack.c.bf16 %v396_v17, %v396_v17 }
  0xfd   : > { %407 = vst.msk [vmem:[%s299_s28 + $0x4] sm:$0xf] %vm405_vm2, %v566_v18 }
  0xfe PF: > { %s13_s14 = sadd.s32 1, %s629_s14   ;;  %s701_s12 = smov %s625_s13 }
  0xff   : > { %p10_p5 = scmp.ge.s32.totalorder %s13_s14, 5   ;;  %s702_s13 = smov %s704_s15 }
 0x101   :  { %12 = sbr.rel (!%p10_p5) target bundleno = 2 (0x2), region = 76 }

// kernel: rotary_self_attention.3
= control target key start
LH: loop header
LB: loop body
LE: loop exit
PB: predicated region body
PF: predicated region fallthrough
CT: control target
= control target key end

     0   :  { %14 = vsyncpa [#allocation7], 0  ;;  %s2103_s0 = inlined_call_operand.vmem [shape: bf16[3,2,8,32], index: 0, kind: input, shape index: {}, may-alias: {0,1,2}]   ;;  %s2104_s1 = inlined_call_operand.vmem [shape: bf16[3,2,8,32], index: 1, kind: input, shape index: {}, may-alias: {0,1,2}]   ;;  %s2105_s2 = inlined_call_operand.vmem [shape: bf16[3,2,8,32], index: 2, kind: input, shape index: {}, may-alias: {0,1,2}]   ;;  %s2106_s3 = inlined_call_operand.vmem [shape: bf16[8,32], index: 3, kind: input, shape index: {}, may-alias: {3,5}]   ;;  %s2107_s4 = inlined_call_operand.vmem [shape: bf16[8,32], index: 4, kind: input, shape index: {}, may-alias: {4,6}]   ;;  %s2108_s5 = inlined_call_operand.vmem [shape: bf16[8,32], index: 5, kind: input, shape index: {}, may-alias: {3,5}]   ;;  %s2109_s6 = inlined_call_operand.vmem [shape: bf16[8,32], index: 6, kind: input, shape index: {}, may-alias: {4,6}]   ;;  %s2110_s7 = inlined_call_operand.vmem [shape: bf16[32,32], index: 7, kind: input, shape index: {}]   ;;  %s2111_s8 = inlined_call_operand.vmem [shape: f32[1,32], index: 8, kind: input, shape index: {}]   ;;  %s2112_s9 = inlined_call_operand.hbm [shape: f32[2,8,32], index: 9, kind: output, shape index: {}]  }
   0x1   :  { %16 = vsyncpa [#allocation7 + $0x1], 0  ;;  %s1789_s30 = smov 0   ;;  %s1791_s10 = smov 0  }
   0x2   :  { %s1793_s11 = smov 0   ;;  %s1795_s12 = smov 0  }
   0x3   :  { %s1797_s13 = smov 0   ;;  %s1799_s14 = smov 0  }
   0x4 LB: > { %s1426_s15 = sadd.s32 4294967295, %s1721_s14   ;;  %s1427_s16 = sadd.s32 4294967294, %s1721_s14   ;;  %s1721_s14 = sphi %s1799_s14, %s22_s14   ;;  %s1717_s13 = sphi %s1797_s13, %s2119_s13   ;;  %s1713_s12 = sphi %s1795_s12, %s2118_s12   ;;  %s1709_s11 = sphi %s1793_s11, %s2117_s11   ;;  %s1705_s10 = sphi %s1791_s10, %s2116_s10   ;;  %s1701_s30 = sphi %s1789_s30, %s2115_s30  }
   0x5   : > { %s41_s17 = sadd.s32 1, %s1717_s13  ;;  %s280_s18 = sadd.s32 1, %s1709_s11 }
   0x6   : > { %p43_p0 = scmp.ge.s32.totalorder %s41_s17, 2  ;;  %p290_p1 = scmp.ne.s32.totalorder %s1709_s11, %s1705_s10 }
   0x7   : > { %p291_p2 = scmp.eq.s32.totalorder %s1426_s15, 1  ;;  %p296_p3 = scmp.ne.s32.totalorder %s1705_s10, %s1701_s30 }
   0x8   : > { %s2121_s17 = smov (%p43_p0, %s41_s17), 0  ;;  %p297_p5 = scmp.eq.s32.totalorder %s1427_s16, 1 }
   0x9   : > { %p1829_p4 = por %p291_p2, %p290_p1  ;;  %s275_s20 = ssub.s32 %s1717_s13, %s2121_s17 }
   0xa   : > { %p1434_p6 = scmp.ge.s32.totalorder %s1721_s14, 1  ;;  %p278_p7 = scmp.eq.s32.totalorder %s275_s20, 0 }
   0xb   : > { %p1836_p8 = por %p297_p5, %p296_p3  ;;  %p381_p9 = scmp.lt.s32.totalorder %s1721_s14, 3 }
   0xc   : > { %s1842_s22 = scalar_select %p278_p7, %s1709_s11, %s280_s18  }
   0xd   : > { %p382_p10 = pnand %p1434_p6, %p381_p9 }
   0xe   : > { %p451_p11 = scmp.lt.s32.totalorder (!%p382_p10), %s1713_s12, 1  ;;  %s1723_s16 = smov (!%p382_p10), 124   ;;  %vm510_vm0 = vcmask (!%p382_p10), 31744   ;;  %v1725_v6 = vmov (!%p382_p10), 0.0   ;;  %vm1726_vm1 = vmmov (!%p382_p10), 0   ;;  %vm512_vm2 = vcmask (!%p382_p10), 64512  }
   0xf   : > { %385 = sbr.rel (%p382_p10) target bundleno = 1826 (0x722), region = 56  ;;  %s1724_s18 = smov (!%p382_p10), 4   ;;  %532 = vst.msk [vmem:[#allocation4] sm:$0xff] (!%p382_p10), %vm510_vm0, %v1725_v6  ;;  %1480 = vmatprep.subr.bf16.mxu0 (!%p382_p10), %v1725_v6  ;;  %1486 = vmatprep.subr.bf16.mxu1 (!%p382_p10), %v1725_v6  ;;  %v537_v9 = vld [vmem:[%s2108_s5] sm:$0xf] (!%p382_p10)  ;;  %vm514_vm3 = vcmask (!%p382_p10), 97280  }
  0x10   : > { %1482 = vmatprep.mubr.msk.bf16.mxu0 (!%p382_p10), %vm1726_vm1, %v1725_v6  ;;  %1488 = vmatprep.mubr.msk.bf16.mxu1 (!%p382_p10), %vm1726_vm1, %v1725_v6  ;;  %v497_v10 = vld [vmem:[%s2106_s3] sm:$0xf] (!%p382_p10)  ;;  %v538_v13 = vunpack.c.l.bf16 (!%p382_p10), %v537_v9  ;;  %vm516_vm4 = vcmask (!%p382_p10), 130048   ;;  %vm518_vm5 = vcmask (!%p382_p10), 162816   ;;  %vm520_vm6 = vcmask (!%p382_p10), 195584   ;;  %s1730_s25 = smov (!%p382_p10), 112  }
  0x11   : > { %v539_v14 = vld [vmem:[%s2109_s6] sm:$0xf] (!%p382_p10)  ;;  %v498_v18 = vunpack.c.l.bf16 (!%p382_p10), %v497_v10  ;;  %vm522_vm7 = vcmask (!%p382_p10), 228352   ;;  %vm529_vm8 = vcmask (!%p382_p10), 257024   ;;  %v1727_v44 = vmov (!%p382_p10), -inf   ;;  %s1731_s26 = smov (!%p382_p10), 104  }
  0x12   : > { %v499_v16 = vld [vmem:[%s2107_s4] sm:$0xf] (!%p382_p10)  ;;  %v540_v23 = vunpack.c.l.bf16 (!%p382_p10), %v539_v14  ;;  %531 = vst.msk [vmem:[#allocation3] sm:$0xff] (!%p382_p10), %vm510_vm0, %v1727_v44  ;;  %v1728_v50 = vmov (!%p382_p10), 0   ;;  %vm638_vm9 = vcmask (!%p382_p10), 7168   ;;  %vm652_vm10 = vcmask (!%p382_p10), 1043456  }
  0x13   : > { %v500_v25 = vunpack.c.l.bf16 (!%p382_p10), %v499_v16  ;;  %1606 = vset.pattern.permute.xlu1 (!%p382_p10), %v1728_v50  ;;  %vm775_vm11 = vcmask (!%p382_p10), 15368   ;;  %vm920_vm12 = vcmask (!%p382_p10), 23568   ;;  %vm1062_vm13 = vcmask (!%p382_p10), 31768   ;;  %s1737_s28 = smov (!%p382_p10), 24   ;;  %s448_s20 = sand.u32 (!%p382_p10), 1, %s1705_s10  }
  0x14   : > { %vm533_vm14 = vcmask (!%p382_p10), 261120   ;;  %vm842_vm15 = vcmask (!%p382_p10), 130112  }
  0x15   : > { %534 = vst.msk [vmem:[#allocation5] sm:$0xff] (!%p382_p10), %vm533_vm14, %v1725_v6 }
  0x16   : > { %s452_s23 = scalar_select %p451_p11, %s1713_s12, 1 }
  0x18   : > { %s1846_s24 = sshll.u32 %s452_s23, 2 }
  0x19   : > { %s1323_s27 = scalar_lea.vmem %s2104_s1, %s1846_s24  ;;  %s457_s15 = scalar_lea.vmem %s2103_s0, %s1846_s24  ;;  %v1892_v51 = vld [vmem:[#allocation3] sm:$0xff] }
  0x1a   : > { %v1439_v0 = vld [vmem:[%s1323_s27 + $0x8] sm:$0xf]  ;;  %v495_v1 = vld [vmem:[%s457_s15] sm:$0xf]  ;;  %s1327_s23 = scalar_lea.vmem %s2105_s2, %s1846_s24  ;;  %s1735_s24 = smov 8  }
  0x1b   : > { %v536_v2 = vunpack.c.l.bf16 %v1439_v0  ;;  %v496_v3 = vunpack.c.l.bf16 %v495_v1  ;;  %v1908_v56 = vld [vmem:[%s1327_s23 + $0x10] sm:$0xf]  ;;  %s1736_s27 = smov 16   ;;  %s1435_s23 = sshll.u32 %s448_s20, 3 }
  0x1c   : > { %v654_v57 = vsel %vm652_vm10, %v1908_v56, 0 }
  0x1d   : > { %v541_v4 = vsub.f32 0.0, %v536_v2  ;;  %v501_v5 = vsub.f32 0.0, %v496_v3  ;;  %v564_v29 = vmul.f32 %v538_v13, %v536_v2  ;;  %v524_v30 = vmul.f32 %v498_v18, %v496_v3  ;;  %1487 = vmatpush3.bf16.msra.mxu1 %v654_v57 }
  0x1e   : > { %1492 = vmatprep.subr.bf16.mxu1 %v1725_v6 }
  0x1f   : > { %543 = vrot.lane.b32.xlu1 %v541_v4, %s1723_s16  ;;  %503 = vrot.lane.b32.xlu0 %v501_v5, %s1723_s16  ;;  %s1729_s16 = smov 120  }
  0x23   : > { %547 = vrot.lane.b32.xlu1 %v536_v2, %s1724_s18  ;;  %507 = vrot.lane.b32.xlu0 %v496_v3, %s1724_s18 }
  0x91   : > { %v544_v7 = vpop.permute.xlu1 %543  ;;  %v504_v8 = vpop.permute.xlu0 %503 }
  0x95   : > { %v548_v11 = vpop.permute.xlu1 %547  ;;  %v508_v12 = vpop.permute.xlu0 %507 }
  0x96   : > { %v551_v15 = vsel %vm510_vm0, %v544_v7, %v548_v11  ;;  %v511_v17 = vsel %vm510_vm0, %v504_v8, %v508_v12  ;;  %vm984_vm0 = vcmask 195712  }
  0x97   : > { %v553_v19 = vsel %vm512_vm2, %v551_v15, %v544_v7  ;;  %v513_v20 = vsel %vm512_vm2, %v511_v17, %v504_v8 }
  0x98   : > { %v555_v21 = vsel %vm514_vm3, %v553_v19, %v548_v11  ;;  %v515_v22 = vsel %vm514_vm3, %v513_v20, %v508_v12 }
  0x99   : > { %v557_v24 = vsel %vm516_vm4, %v555_v21, %v544_v7  ;;  %v517_v26 = vsel %vm516_vm4, %v515_v22, %v504_v8 }
  0x9a   : > { %v559_v27 = vsel %vm518_vm5, %v557_v24, %v548_v11  ;;  %v519_v28 = vsel %vm518_vm5, %v517_v26, %v508_v12 }
  0x9b   : > { %v561_v31 = vsel %vm520_vm6, %v559_v27, %v544_v7  ;;  %v521_v32 = vsel %vm520_vm6, %v519_v28, %v504_v8 }
  0x9c   : > { %v563_v33 = vsel %vm522_vm7, %v561_v31, %v548_v11  ;;  %v523_v34 = vsel %vm522_vm7, %v521_v32, %v508_v12  ;;  %v1733_v31 = vmov 2  }
  0x9d   : > { %v565_v35 = vmul.f32 %v563_v33, %v540_v23  ;;  %v525_v36 = vmul.f32 %v523_v34, %v500_v25 }
  0x9f   : > { %v566_v37 = vadd.f32 %v565_v35, %v564_v29  ;;  %v526_v38 = vadd.f32 %v525_v36, %v524_v30  ;;  %v1732_v30 = vmov 1   ;;  %v1734_v36 = vmov 3  }
  0xa0   : > { %1607 = vset.pattern.permute.xlu0 %v1732_v30 }
  0xa1   : > { %v527_v39 = vmul.f32 0.35355338, %v526_v38  ;;  %v567_v40 = vpack.c.bf16 %v566_v37, %v566_v37 }
  0xa3   : > { %v528_v41 = vpack.c.bf16 %v527_v39, %v527_v39  ;;  %v574_v42 = vsel %vm512_vm2, %v567_v40, 0 }
  0xa4   : > { %1481 = vmatpush3.bf16.xpose.msra.mxu0 %v574_v42 }
  0xa5   : > { %530 = vst.msk [vmem:[#allocation2] sm:$0xf] %vm529_vm8, %v528_v41  ;;  %1498 = vmatprep.subr.bf16.mxu0 %v1725_v6 }
  0xac   : > { %v569_v43 = vld [vmem:[#allocation2] sm:$0xf] }
  0xad   : > { %1483 = vmatmul.mubr.msk.bf16.vlgmr.msra.gmra.mrb[0].mxu0 %vm512_vm2, %v569_v43  ;;  %v1619_v55 = vld [vmem:[#allocation2] ss:$0 sps:$4 sm:$0xff]  }
  0xae   : > { %1500 = vmatprep.mubr.msk.bf16.mxu0 %vm1726_vm1, %v1725_v6  ;;  %v1620_v58 = vld [vmem:[#allocation2] ss:$0 sps:$4 sm:$0xff]  }
  0xaf   : > { %v1621_v59 = vld [vmem:[#allocation2] ss:$0 sps:$4 sm:$0xff]  }
 0x180   : > { %v610_v45 = vpop.f32.mrb[0].mxu0 }
 0x181   : > { %v1484_v46 = vpop.f32.mrb[1].mxu0  ;;  %v617_v47 = vsel %vm512_vm2, %v610_v45, -inf }
 0x182   : > { %618 = vmax.xlane.f32.xlu0 %v617_v47  ;;  %v613_v48 = vpop.f32.mrb[2].mxu0 }
 0x183   : > { %v1485_v49 = vpop.f32.mrb[3].mxu0 }
 0x20f   : > { %v619_v52 = vpop.xlane.xlu0 %618 }
 0x210   : > { %v1895_v53 = vmax.f32 %v1892_v51, %v619_v52 }
 0x212   : > { %v621_v54 = vsub.f32 %v1892_v51, %v1895_v53  ;;  %640 = vst.msk [vmem:[#allocation3] sm:$0xff] %vm638_vm9, %v1895_v53  ;;  %626 = vperm.xlu1 %1606, %v1895_v53  }
 0x216   : > { %705 = vrot.lane.b32.xlu1 %v567_v40, %s1729_s16 }
 0x217   : > { %1608 = vset.pattern.permute.xlu1 %v1733_v31 }
 0x219   : > { %v1949_v33 = vld [vmem:[#allocation3] sm:$0xff] }
 0x21a   : > { %702 = vrot.lane.b32.xlu1 %v1619_v55, %s1729_s16 }
 0x21e   : > { %850 = vrot.lane.b32.xlu1 %v567_v40, %s1730_s25 }
 0x222   : > { %848 = vrot.lane.b32.xlu1 %v1620_v58, %s1730_s25 }
 0x226   : > { %992 = vrot.lane.b32.xlu1 %v567_v40, %s1731_s26  ;;  %v1445_v40 = vcombine.low %v1908_v56, %v1908_v56 }
 0x22a   : > { %990 = vrot.lane.b32.xlu1 %v1621_v59, %s1731_s26 }
 0x291   : > { %v627_v60 = vpop.permute.xlu1 %626 }
 0x292   : > { %v629_v61 = vsub.f32 %v610_v45, %v627_v60 }
 0x294   : > { %v630_v62 = vmul.f32 1.442695, %v629_v61 }
 0x295   : > { %v706_v63 = vpop.permute.xlu1 %705 }
 0x296   : > { %1625 = vpow2.f32 %v630_v62  ;;  %v711_v3 = vsel %vm512_vm2, %v706_v63, 0  ;;  %v622_v63 = vmul.f32 1.442695, %v621_v54 }
 0x299   : > { %v703_v0 = vpop.permute.xlu1 %702 }
 0x29d   : > { %v851_v4 = vpop.permute.xlu1 %850 }
 0x29e   : > { %v856_v7 = vsel %vm512_vm2, %v851_v4, 0 }
 0x2a0   : > { %v1917_v1 = vpop.eup %1625 }
 0x2a1   : > { %v648_v2 = vpack.c.bf16 %v1917_v1, %v1917_v1  ;;  %v849_v5 = vpop.permute.xlu1 %848  ;;  %v634_v46 = vsel %vm512_vm2, %v1917_v1, 0.0 }
 0x2a3   : > { %1489 = vmatmul.mubr.msk.bf16.vlgmr.msra.gmra.mrb[0].mxu1 %vm512_vm2, %v648_v2 }
 0x2a4   : > { %1493 = vmatpush3.bf16.xpose.msra.mxu1 %v711_v3  ;;  %1494 = vmatprep.mubr.msk.bf16.mxu1 %vm1726_vm1, %v1725_v6 }
 0x2a5   : > { %1504 = vmatprep.subr.bf16.mxu1 %v1725_v6  ;;  %v993_v8 = vpop.permute.xlu1 %992 }
 0x2a6   : > { %v998_v9 = vsel %vm512_vm2, %v993_v8, 0 }
 0x2a9   : > { %v991_v10 = vpop.permute.xlu1 %990 }
 0x2ab   : > { %1495 = vmatmul.mubr.msk.bf16.vlgmr.msra.gmra.mrb[4].mxu1 %vm512_vm2, %v703_v0 }
 0x2ac   : > { %1505 = vmatpush3.bf16.xpose.msra.mxu1 %v856_v7  ;;  %1506 = vmatprep.mubr.msk.bf16.mxu1 %vm1726_vm1, %v1725_v6 }
 0x2ad   : > { %1516 = vmatprep.subr.bf16.mxu1 %v1725_v6 }
 0x2b3   : > { %1507 = vmatmul.mubr.msk.bf16.vlgmr.msra.gmra.mrb[8].mxu1 %vm512_vm2, %v849_v5 }
 0x2b4   : > { %1517 = vmatpush3.bf16.xpose.msra.mxu1 %v998_v9  ;;  %1518 = vmatprep.mubr.msk.bf16.mxu1 %vm1726_vm1, %v1725_v6 }
 0x2b5   : > { %1528 = vmatprep.subr.bf16.mxu1 %v1725_v6 }
 0x2bb   : > { %1519 = vmatmul.mubr.msk.bf16.vlgmr.msra.gmra.mrb[12].mxu1 %vm512_vm2, %v991_v10 }
 0x2bc   : > { %1532 = vmatprep.mubr.msk.bf16.mxu1 %vm1726_vm1, %v1725_v6 }
 0x376   : > { %v1939_v11 = vpop.f32.mrb[0].mxu1 }
 0x377   : > { %v1490_v12 = vpop.f32.mrb[1].mxu1 }
 0x378   : > { %v693_v13 = vpop.f32.mrb[2].mxu1 }
 0x379   : > { %v1491_v14 = vpop.f32.mrb[3].mxu1 }
 0x37a   : > { %v632_v14 = vld [vmem:[#allocation4] sm:$0xff] }
 0x37e   : > { %v747_v15 = vpop.f32.mrb[4].mxu1 }
 0x37f   : > { %v1496_v16 = vpop.f32.mrb[5].mxu1  ;;  %v754_v17 = vsel %vm512_vm2, %v747_v15, -inf }
 0x380   : > { %755 = vmax.xlane.f32.xlu1 %v754_v17  ;;  %v750_v18 = vpop.f32.mrb[6].mxu1 }
 0x381   : > { %v1497_v19 = vpop.f32.mrb[7].mxu1 }
 0x386   : > { %v892_v20 = vpop.f32.mrb[8].mxu1 }
 0x387   : > { %v1508_v21 = vpop.f32.mrb[9].mxu1  ;;  %v899_v22 = vsel %vm512_vm2, %v892_v20, -inf }
 0x388   : > { %900 = vmax.xlane.f32.xlu0 %v899_v22  ;;  %v895_v23 = vpop.f32.mrb[10].mxu1 }
 0x389   : > { %v1509_v24 = vpop.f32.mrb[11].mxu1  ;;  %v641_v23 = vld [vmem:[#allocation5] sm:$0xff] }
 0x38e   : > { %v1943_v25 = vpop.f32.mrb[12].mxu1 }
 0x38f   : > { %v1520_v26 = vpop.f32.mrb[13].mxu1  ;;  %v1041_v27 = vsel %vm512_vm2, %v1943_v25, -inf }
 0x390   : > { %1042 = vmax.xlane.f32.xlu0 %v1041_v27  ;;  %v1037_v28 = vpop.f32.mrb[14].mxu1 }
 0x391   : > { %v1521_v29 = vpop.f32.mrb[15].mxu1 }
 0x40d   : > { %v756_v32 = vpop.xlane.xlu1 %755 }
 0x40e   : > { %v1952_v34 = vmax.f32 %v1949_v33, %v756_v32 }
 0x410   : > { %v758_v35 = vsub.f32 %v1949_v33, %v1952_v34  ;;  %777 = vst.msk [vmem:[#allocation3] sm:$0xff] %vm775_vm11, %v1952_v34  ;;  %763 = vperm.xlu0 %1607, %v1952_v34  }
 0x412   : > { %v759_v12 = vmul.f32 1.442695, %v758_v35 }
 0x414   : > { %1609 = vset.pattern.permute.xlu0 %v1734_v36 }
 0x415   : > { %v901_v37 = vpop.xlane.xlu0 %900 }
 0x417   : > { %v1960_v38 = vld [vmem:[#allocation3] sm:$0xff] }
 0x418   : > { %v1963_v39 = vmax.f32 %v1960_v38, %v901_v37 }
 0x41a   : > { %v903_v41 = vsub.f32 %v1960_v38, %v1963_v39  ;;  %922 = vst.msk [vmem:[#allocation3] sm:$0xff] %vm920_vm12, %v1963_v39  ;;  %908 = vperm.xlu1 %1608, %v1963_v39  }
 0x41c   : > { %v904_v18 = vmul.f32 1.442695, %v903_v41 }
 0x41d   : > { %v1043_v42 = vpop.xlane.xlu0 %1042 }
 0x41e   : > { %789 = vrot.lane.b32.xlu1 %v1445_v40, %s1729_s16 }
 0x41f   : > { %1610 = vset.pattern.permute.xlu1 %v1728_v50 }
 0x421   : > { %v1974_v43 = vld [vmem:[#allocation3] sm:$0xff] }
 0x422   : > { %v1977_v44 = vmax.f32 %v1974_v43, %v1043_v42  ;;  %931 = vrot.lane.b32.xlu1 %v1445_v40, %s1730_s25 }
 0x424   : > { %v1045_v45 = vsub.f32 %v1974_v43, %v1977_v44  ;;  %1064 = vst.msk [vmem:[#allocation3] sm:$0xff] %vm1062_vm13, %v1977_v44  ;;  %1050 = vperm.xlu0 %1609, %v1977_v44  }
 0x426   : > { %1073 = vrot.lane.b32.xlu1 %v1445_v40, %s1731_s26  ;;  %v1046_v27 = vmul.f32 1.442695, %v1045_v45 }
 0x428   : > { %1611 = vset.pattern.permute.xlu0 %v1732_v30 }
 0x443   : > { %635 = vadd.xlane.f32.xlu0 %v634_v46 }
 0x48f   : > { %v764_v47 = vpop.permute.xlu0 %763 }
 0x490   : > { %v766_v48 = vsub.f32 %v747_v15, %v764_v47 }
 0x492   : > { %v767_v49 = vmul.f32 1.442695, %v766_v48 }
 0x494   : > { %1627 = vpow2.f32 %v767_v49 }
 0x499   : > { %v909_v52 = vpop.permute.xlu1 %908 }
 0x49a   : > { %v911_v55 = vsub.f32 %v892_v20, %v909_v52 }
 0x49c   : > { %v912_v56 = vmul.f32 1.442695, %v911_v55 }
 0x49d   : > { %v790_v57 = vpop.permute.xlu1 %789 }
 0x49e   : > { %v1628_v58 = vpop.eup %1627  ;;  %1629 = vpow2.f32 %v912_v56  ;;  %v795_v59 = vsel %vm652_vm10, %v790_v57, 0  ;;  %v1623_v57 = vld [vmem:[%s2110_s7] sm:$0xff]  }
 0x49f   : > { %1499 = vmatpush3.bf16.msra.mxu0 %v795_v59  ;;  %v771_v60 = vsel %vm512_vm2, %v1628_v58, 0.0  ;;  %v785_v61 = vpack.c.bf16 %v1628_v58, %v1628_v58  ;;  %1631 = vpow2.f32 %v622_v63  ;;  %1529 = vmatpush3.bf16.msra.mxu1 %v1623_v57 }
 0x4a0   : > { %772 = vadd.xlane.f32.xlu1 %v771_v60  ;;  %1510 = vmatprep.subr.bf16.mxu0 %v1725_v6 }
 0x4a1   : > { %v932_v62 = vpop.permute.xlu1 %931  ;;  %1530 = vmatprep.subr.bf16.mxu1 %v1725_v6 }
 0x4a2   : > { %1501 = vmatmul.mubr.msk.bf16.vlgmr.msra.gmra.mrb[4].mxu0 %vm512_vm2, %v785_v61  ;;  %v937_v0 = vsel %vm652_vm10, %v932_v62, 0 }
 0x4a3   : > { %v1051_v1 = vpop.permute.xlu0 %1050  ;;  %1511 = vmatpush3.bf16.msra.mxu0 %v937_v0  ;;  %1512 = vmatprep.mubr.msk.bf16.mxu0 %vm1726_vm1, %v1725_v6 }
 0x4a4   : > { %v1053_v2 = vsub.f32 %v1943_v25, %v1051_v1  ;;  %1522 = vmatprep.subr.bf16.mxu0 %v1725_v6 }
 0x4a5   : > { %v1074_v4 = vpop.permute.xlu1 %1073 }
 0x4a6   : > { %v1054_v3 = vmul.f32 1.442695, %v1053_v2  ;;  %v1079_v54 = vsel %vm652_vm10, %v1074_v4, 0 }
 0x4a8   : > { %v1630_v5 = vpop.eup %1629  ;;  %1633 = vpow2.f32 %v1054_v3 }
 0x4a9   : > { %v916_v51 = vsel %vm512_vm2, %v1630_v5, 0.0  ;;  %v930_v53 = vpack.c.bf16 %v1630_v5, %v1630_v5  ;;  %v1632_v7 = vpop.eup %1631  ;;  %1635 = vpow2.f32 %v759_v12 }
 0x4aa   : > { %917 = vadd.xlane.f32.xlu0 %v916_v51  ;;  %v633_v15 = vmul.f32 %v1632_v7, %v632_v14  ;;  %1637 = vpow2.f32 %v904_v18 }
 0x4ab   : > { %1513 = vmatmul.mubr.msk.bf16.vlgmr.msra.gmra.mrb[8].mxu0 %vm512_vm2, %v930_v53  ;;  %1639 = vpow2.f32 %v1046_v27 }
 0x4ac   : > { %1523 = vmatpush3.bf16.msra.mxu0 %v1079_v54  ;;  %1524 = vmatprep.mubr.msk.bf16.mxu0 %vm1726_vm1, %v1725_v6  ;;  %vm1126_vm1 = vcmask 261312  }
 0x4b1   : > { %644 = vperm.xlu1 %1610, %v1632_v7  }
 0x4b2   : > { %v1634_v8 = vpop.eup %1633 }
 0x4b3   : > { %v1058_v9 = vsel %vm512_vm2, %v1634_v8, 0.0  ;;  %v1072_v10 = vpack.c.bf16 %v1634_v8, %v1634_v8  ;;  %v1636_v13 = vpop.eup %1635 }
 0x4b4   : > { %1059 = vadd.xlane.f32.xlu0 %v1058_v9  ;;  %v1638_v28 = vpop.eup %1637 }
 0x4b5   : > { %1525 = vmatmul.mubr.msk.bf16.vlgmr.msra.gmra.mrb[12].mxu0 %vm512_vm2, %v1072_v10  ;;  %1612 = vset.pattern.permute.xlu1 %v1733_v31  ;;  %v1640_v34 = vpop.eup %1639 }
 0x4ca   : > { %781 = vperm.xlu0 %1611, %v1636_v13  }
 0x4ce   : > { %1616 = vset.pattern.permute.xlu0 %v1733_v31 }
 0x4d0   : > { %v636_v16 = vpop.xlane.xlu0 %635 }
 0x4d1   : > { %v637_v17 = vadd.f32 %v636_v16, %v633_v15 }
 0x4d3   : > { %639 = vst.msk [vmem:[#allocation4] sm:$0xff] %vm638_vm9, %v637_v17 }
 0x4da   : > { %v769_v19 = vld [vmem:[#allocation4] sm:$0xff] }
 0x4db   : > { %v770_v20 = vmul.f32 %v1636_v13, %v769_v19  ;;  %v1453_v19 = vld [vmem:[%s2111_s8] ss:$0 sm:$0xff] }
 0x52d   : > { %v773_v21 = vpop.xlane.xlu1 %772 }
 0x52e   : > { %v774_v22 = vadd.f32 %v773_v21, %v770_v20 }
 0x530   : > { %776 = vst.msk [vmem:[#allocation4] sm:$0xff] %vm775_vm11, %v774_v22 }
 0x531   : > { %v645_v24 = vpop.permute.xlu1 %644 }
 0x532   : > { %v647_v25 = vmul.f32 %v645_v24, %v641_v23 }
 0x534   : > { %v696_v26 = vadd.f32 %v1939_v11, %v647_v25 }
 0x536   : > { %697 = vst.msk [vmem:[#allocation5] sm:$0xff] %vm512_vm2, %v696_v26 }
 0x537   : > { %v914_v29 = vld [vmem:[#allocation4] sm:$0xff]  ;;  %v918_v32 = vpop.xlane.xlu0 %917 }
 0x538   : > { %v915_v31 = vmul.f32 %v1638_v28, %v914_v29 }
 0x53a   : > { %v919_v33 = vadd.f32 %v918_v32, %v915_v31 }
 0x53c   : > { %921 = vst.msk [vmem:[#allocation4] sm:$0xff] %vm920_vm12, %v919_v33 }
 0x53d   : > { %v778_v59 = vld [vmem:[#allocation5] sm:$0xff] }
 0x541   : > { %v1060_v38 = vpop.xlane.xlu0 %1059 }
 0x543   : > { %v1056_v35 = vld [vmem:[#allocation4] sm:$0xff] }
 0x544   : > { %v1057_v37 = vmul.f32 %v1640_v34, %v1056_v35 }
 0x546   : > { %v1061_v39 = vadd.f32 %v1060_v38, %v1057_v37 }
 0x548   : > { %1063 = vst.msk [vmem:[#allocation4] sm:$0xff] %vm1062_vm13, %v1061_v39 }
 0x549   : > { %v782_v58 = vpop.permute.xlu0 %781 }
 0x54a   : > { %v784_v60 = vmul.f32 %v782_v58, %v778_v59 }
 0x54f   : > { %v1152_v11 = vld [vmem:[#allocation4] sm:$0xff] }
 0x550   : > { %1641 = vrcp.f32 %v1152_v11 }
 0x55a   : > { %v1642_v40 = vpop.eup %1641 }
 0x55b   : > { %1156 = vperm.xlu0 %1616, %v1642_v40  }
 0x55f   : > { %1618 = vset.pattern.permute.xlu0 %v1734_v36 }
 0x575   : > { %v831_v41 = vpop.f32.mrb[4].mxu0 }
 0x576   : > { %838 = vrot.lane.b32.xlu1 %v831_v41, %s1735_s24  ;;  %v1502_v42 = vpop.f32.mrb[5].mxu0  ;;  %s1458_s24 = sshll.u32 %s1713_s12, 7  ;;  %s1242_s12 = scalar_lea.sflag [#allocation7], %s448_s20 }
 0x577   : > { %v834_v43 = vpop.f32.mrb[6].mxu0  ;;  %s2055_s16 = scalar_lea.hbm %s2112_s9, %s1458_s24 }
 0x578   : > { %v1503_v44 = vpop.f32.mrb[7].mxu0 }
 0x57a   : > { %926 = vperm.xlu1 %1612, %v1638_v28  }
 0x57e   : > { %v973_v45 = vpop.f32.mrb[8].mxu0  ;;  %1613 = vset.pattern.permute.xlu1 %v1734_v36 }
 0x57f   : > { %980 = vrot.lane.b32.xlu1 %v973_v45, %s1736_s27  ;;  %v1514_v46 = vpop.f32.mrb[9].mxu0  ;;  %s450_s27 = scalar_lea.vmem [#allocation6], %s1435_s23  ;;  %s1738_s23 = smov [#allocation6]  }
 0x580   : > { %v976_v47 = vpop.f32.mrb[10].mxu0  ;;  %s1647_s25 = sshll.u32 %s1738_s23, 4  ;;  %s1648_s25 = int_to_ptr.vmem [resolvable:$false] %s1647_s25 }
 0x581   : > { %v1515_v48 = vpop.f32.mrb[11].mxu0  ;;  %s1649_s26 = scalar_lea.vmem %s1648_s25, 256 }
 0x583   : > { %1068 = vperm.xlu1 %1613, %v1640_v34  }
 0x587   : > { %1614 = vset.pattern.permute.xlu1 %v1728_v50  ;;  %v1624_v50 = vld [vmem:[%s2110_s7 + $0x8] sm:$0xff]  }
 0x588   : > { %v1115_v49 = vpop.f32.mrb[12].mxu0  ;;  %1531 = vmatpush3.bf16.msra.mxu1 %v1624_v50 }
 0x589   : > { %1122 = vrot.lane.b32.xlu1 %v1115_v49, %s1737_s28  ;;  %v1526_v52 = vpop.f32.mrb[13].mxu0  ;;  %s1256_s28 = sshll.u32 %s450_s27, 4  ;;  %s2057_s28 = int_to_ptr.vmem [resolvable:$true] %s1256_s28 }
 0x58a   : > { %v1118_v55 = vpop.f32.mrb[14].mxu0  ;;  %s1643_s18 = scalar_lea.vmem %s2057_s28, 128  ;;  %p1650_p1 = scmp.lt.s32.totalorder %s2057_s28, %s1648_s25 }
 0x58b   : > { %v1527_v56 = vpop.f32.mrb[15].mxu0  ;;  %p1644_p12 = scmp.ne.s32.totalorder %s2057_s28, %s1643_s18  ;;  %p1651_p2 = scmp.lt.s32.totalorder %s1649_s26, %s1643_s18 }
 0x58d   : > { %1136 = vperm.xlu1 %1614, %v1642_v40   ;;  %p1645_p13 = pnand %p1644_p12, %p1829_p4  ;;  %p1652_p3 = por %p1651_p2, %p1650_p1 }
 0x58f   : > { %p1646_p0 = pneg %p1645_p13 }
 0x591   : > { %1615 = vset.pattern.permute.xlu1 %v1732_v30  ;;  %p1653_p5 = pnand %p1652_p3, %p1646_p0 }
 0x592   : > { %1146 = vperm.xlu1 %1615, %v1642_v40  }
 0x596   : > { %1617 = vset.pattern.permute.xlu1 %v1734_v36 }
 0x597   : > { %1166 = vperm.xlu1 %1617, %v1642_v40  }
 0x5da   : > { %v1157_v10 = vpop.permute.xlu0 %1156 }
 0x5e8   : > { %v839_v30 = vpop.permute.xlu1 %838 }
 0x5e9   : > { %v841_v61 = vadd.f32 %v839_v30, %v784_v60 }
 0x5eb   : > { %843 = vst.msk [vmem:[#allocation5] sm:$0xff] %vm842_vm15, %v841_v61 }
 0x5f2   : > { %v923_v62 = vld [vmem:[#allocation5] sm:$0xff] }
 0x5f9   : > { %v927_v36 = vpop.permute.xlu1 %926 }
 0x5fa   : > { %v929_v63 = vmul.f32 %v927_v36, %v923_v62 }
 0x5fd   : > { %v981_v0 = vpop.permute.xlu1 %980 }
 0x5fe   : > { %v983_v1 = vadd.f32 %v981_v0, %v929_v63 }
 0x600   : > { %985 = vst.msk [vmem:[#allocation5] sm:$0xff] %vm984_vm0, %v983_v1 }
 0x602   : > { %v1069_v2 = vpop.permute.xlu1 %1068 }
 0x606   : > { %v1123_v4 = vpop.permute.xlu1 %1122 }
 0x607   : > { %v1065_v3 = vld [vmem:[#allocation5] sm:$0xff] }
 0x608   : > { %v1071_v6 = vmul.f32 %v1069_v2, %v1065_v3 }
 0x60a   : > { %v1125_v5 = vadd.f32 %v1123_v4, %v1071_v6 }
 0x60c   : > { %1127 = vst.msk [vmem:[#allocation5] sm:$0xff] %vm1126_vm1, %v1125_v5  ;;  %v1137_v53 = vpop.permute.xlu1 %1136 }
 0x611   : > { %v1147_v8 = vpop.permute.xlu1 %1146 }
 0x613   : > { %v1131_v51 = vld [vmem:[#allocation5] sm:$0xff] }
 0x614   : > { %v1139_v54 = vmul.f32 %v1137_v53, %v1131_v51 }
 0x616   : > { %1140 = vst.msk [vmem:[#allocation5] sm:$0xff] %vm512_vm2, %v1139_v54  ;;  %v1167_v15 = vpop.permute.xlu1 %1166 }
 0x61d   : > { %v1141_v7 = vld [vmem:[#allocation5] sm:$0xff] }
 0x61e   : > { %v1149_v9 = vmul.f32 %v1147_v8, %v1141_v7 }
 0x620   : > { %1150 = vst.msk [vmem:[#allocation5] sm:$0xff] %vm842_vm15, %v1149_v9 }
 0x627   : > { %v1151_v12 = vld [vmem:[#allocation5] sm:$0xff] }
 0x628   : > { %v1159_v13 = vmul.f32 %v1157_v10, %v1151_v12 }
 0x62a   : > { %1160 = vst.msk [vmem:[#allocation5] sm:$0xff] %vm984_vm0, %v1159_v13 }
 0x631   : > { %v1161_v14 = vld [vmem:[#allocation5] sm:$0xff] }
 0x632   : > { %v1169_v16 = vmul.f32 %v1167_v15, %v1161_v14 }
 0x634   : > { %1170 = vst.msk [vmem:[#allocation5] sm:$0xff] %vm1126_vm1, %v1169_v16 }
 0x63b   : > { %v1171_v17 = vld [vmem:[#allocation5] sm:$0xff] }
 0x63c   : > { %v1172_v18 = vpack.c.bf16 %v1171_v17, %v1171_v17 }
 0x63e   : > { %1533 = vmatmul.mubr.msk.bf16.vlgmr.msra.gmra.mrb[16].mxu1 %vm533_vm14, %v1172_v18 }
 0x711   : > { %v1234_v20 = vpop.f32.mrb[16].mxu1 }
 0x712   : > { %v1235_v21 = vadd.f32 %v1453_v19, %v1234_v20  ;;  %v1534_v22 = vpop.f32.mrb[17].mxu1 }
 0x713   : > { %v1237_v23 = vpop.f32.mrb[18].mxu1 }
 0x714   : > { %v1535_v24 = vpop.f32.mrb[19].mxu1  ;;  %1240 = vst.msk [vmem:[%s450_s27] sm:$0xff] %vm533_vm14, %v1235_v21 }
 0x715   : > { %1656 = shalt.err (!%p1653_p5)
}
 0x716   : > { %s1657_s20 = scalar_lea.hbm %s2055_s16, 128  ;;  %s1661_s29 = scalar_lea.hbm %s2112_s9, 256 }
 0x717   : > { %p1658_p6 = scmp.ne.s32.totalorder %s2055_s16, %s1657_s20  ;;  %p1662_p10 = scmp.lt.u32.totalorder %s2055_s16, %s2112_s9 }
 0x718   : > { %p1663_p11 = scmp.lt.u32.totalorder %s1661_s29, %s1657_s20  ;;  %p1665_p13 = scmp.lt.u32.totalorder %s1657_s20, %s2055_s16 }
 0x719   : > { %p1659_p7 = pnand %p1658_p6, %p1829_p4 }
 0x71a   : > { %p1664_p12 = por %p1663_p11, %p1662_p10 }
 0x71b   : > { %p1660_p9 = pneg %p1659_p7 }
 0x71c   : > { %p1666_p0 = por %p1665_p13, %p1664_p12 }
 0x71e   : > { %p1667_p1 = pnand %p1666_p0, %p1660_p9 }
 0x720   : > { %1670 = shalt.err (!%p1667_p1)
}
 0x721   : > { %1536 = dma.vmem_to_hbm [thread:$0]  (%p1829_p4), %s2057_s28, 128, %s2055_s16, %s1242_s12  }
 0x722 PF: > { %p1542_p2 = scmp.ge.s32.totalorder %s1721_s14, 2  ;;  %s1268_s18 = sand.u32 1, %s1701_s30  }
 0x723   : > { %s1269_s25 = scalar_lea.sflag [#allocation7], %s1268_s18 }
 0x724   : > { %p1539_p3 = pnand %p1542_p2, %p1836_p8 }
 0x726   : > { %1696 = dma.done.wait (!%p1539_p3), %s1269_s25, 128  }
 0x727   : > { %1698 = vsyncadd (!%p1539_p3), %s1269_s25, 4294967168  ;;  %s22_s14 = sadd.s32 1, %s1721_s14   ;;  %s2115_s30 = smov %s1705_s10 }
 0x728   : > { %p19_p5 = scmp.ge.s32.totalorder %s22_s14, 4   ;;  %s2116_s10 = smov %s1709_s11 }
 0x729   : > { %s2117_s11 = smov %s1842_s22  ;;  %s2118_s12 = smov %s1717_s13 }
 0x72a   : > { %s2119_s13 = smov %s2121_s17  ;;  %21 = sbr.rel (!%p19_p5) target bundleno = 4 (0x4), region = 117 }
 0x731   :  { %1274 = vsyncpa [#allocation7], 1 }
 0x732   :  { %1276 = vsyncpa [#allocation7 + $0x1], 1 }

</bundles_post_ra>
